<compile_context>
chip_gen: v6e
topology: v6e:2x2x1
jax: 0.10.0
libtpu: 0.0.40
codegen_flags: <defaults>
</compile_context>

<pallas_src>
import functools

import jax
import jax.numpy as jnp
import numpy as np
from jax.experimental import pallas as pl
from jax.experimental.pallas import tpu as pltpu


def sca_kernel(eh_ref, er_ref, conv_ref, w1bd_ref, w2p_ref, cb_ref, out_ref, *, TB):
    """One grid step processes TB samples.

    eh_ref, er_ref, out_ref : (TB, C, HW)  lane-dense feature maps
    conv_ref                : (2*HW, HW)   BN-folded dense 7x7 conv matrix
    w1bd_ref                : (2r, 2C)     block-diag [W1_avg, 0; 0, W1_max]
    w2p_ref                 : (C, 2r)      [W2_avg | W2_max]
    cb_ref                  : (1,) SMEM    folded BN bias
    """
    conv_mat = conv_ref[...]        # stays resident (constant index_map)
    w1bd = w1bd_ref[...]
    w2p = w2p_ref[...]
    bias = cb_ref[0]

    # Static per-sample loop: all heavy ops below are full-lane-width 2D work
    # (C, HW); each sample's store ends its live range so vreg pressure stays low.
    for t in range(TB):
        eh_t = eh_ref[t].astype(jnp.float32)            # (C, HW)
        er_t = er_ref[t].astype(jnp.float32)            # (C, HW)

        # ---- spatial attention path (E_H): channel sum/max -> one MXU matmul ----
        ch_sum = jnp.sum(eh_t, axis=0, keepdims=True)   # (1, HW); 1/C folded into conv_mat
        ch_max = jnp.max(eh_t, axis=0, keepdims=True)   # (1, HW)
        feat = jnp.concatenate([ch_sum, ch_max], axis=1)            # (1, 2*HW), aligned lane concat
        logits = jnp.dot(feat, conv_mat,
                         preferred_element_type=jnp.float32)        # (1, HW)
        spatial_mask = jax.nn.sigmoid(logits + bias)                # (1, HW)

        # ---- channel attention path (E_R): pooled column -> block-diag fused MLP ----
        avg_c = jnp.mean(er_t, axis=1, keepdims=True)   # (C, 1)
        max_c = jnp.max(er_t, axis=1, keepdims=True)    # (C, 1)
        pools = jnp.concatenate([avg_c, max_c], axis=0)             # (2C, 1), aligned sublane concat
        hidden = jax.nn.relu(jnp.dot(w1bd, pools,
                                     preferred_element_type=jnp.float32))   # (2r, 1)
        chan_logits = jnp.dot(w2p, hidden,
                              preferred_element_type=jnp.float32)           # (C, 1)
        channel_mask = jax.nn.sigmoid(chan_logits)                  # (C, 1)

        # ---- merge: single full-width (C, HW) store per sample ----
        out_ref[t] = (eh_t * spatial_mask + er_t * channel_mask).astype(out_ref.dtype)


def make_params(channels, key):
    reduction = max(1, channels // 8)
    k = jax.random.split(key, 5)
    params = dict(
        conv_w=jax.random.normal(k[0], (1, 2, 7, 7), jnp.float32) * 0.1,
        w1_avg=jax.random.normal(k[1], (reduction, channels), jnp.float32) * 0.2,
        w2_avg=jax.random.normal(k[2], (channels, reduction), jnp.float32) * 0.2,
        w1_max=jax.random.normal(k[3], (reduction, channels), jnp.float32) * 0.2,
        w2_max=jax.random.normal(k[4], (channels, reduction), jnp.float32) * 0.2,
        bn=dict(gamma=jnp.float32(1.3), beta=jnp.float32(-0.05),
                mean=jnp.float32(0.02), var=jnp.float32(0.9), eps=jnp.float32(1e-5)),
    )
    return params


def sca_forward(e_h, e_r, params):
    B, C, H, W = e_h.shape
    HW = H * W
    bn = params["bn"]
    scale = bn["gamma"] / jnp.sqrt(bn["var"] + bn["eps"])
    bias = (bn["beta"] - bn["mean"] * scale).astype(jnp.float32)

    # Dense conv matrix: BN-folded, zero-padded 7x7 conv expressed as
    # out_flat = in_flat @ M.  Built by convolving one-hot images (exact by
    # linearity, borders included).  1/C of the channel mean is folded into
    # the channel-0 block so the kernel only computes a channel sum.
    w = (params["conv_w"][0] * scale).astype(jnp.float32)           # (2, 7, 7)
    eye_maps = jnp.eye(HW, dtype=jnp.float32).reshape(HW, 1, H, W)

    def _chan_mat(k2d):
        resp = jax.lax.conv_general_dilated(
            eye_maps, k2d[None, None], window_strides=(1, 1),
            padding=[(3, 3), (3, 3)],
            dimension_numbers=("NCHW", "OIHW", "NCHW"))
        return resp.reshape(HW, HW)

    conv_mat = jnp.concatenate([_chan_mat(w[0]) / C, _chan_mat(w[1])], axis=0)  # (2HW, HW)
    cb = bias.reshape(1)

    r = params["w1_avg"].shape[0]
    # Block-diagonal first layer: [W1_avg 0; 0 W1_max]  (2r, 2C)
    w1bd = jnp.zeros((2 * r, 2 * C), jnp.float32)
    w1bd = w1bd.at[:r, :C].set(params["w1_avg"])
    w1bd = w1bd.at[r:, C:].set(params["w1_max"])
    w2p = jnp.concatenate([params["w2_avg"], params["w2_max"]], axis=1)  # (C, 2r)

    # Lane-dense layout: fold H*W into the lane dimension (wrapper-side reshape).
    eh_flat = e_h.reshape(B, C, HW)
    er_flat = e_r.reshape(B, C, HW)

    # Batch TB samples per grid step; keep >= 2 steps when possible so v7x's
    # two TensorCores both get work.
    # TODO(synk): on single-TC chips (v5e/v6e) TB=B / one step saves one more
    # ~600-cycle step; left at 2 steps to avoid idling v7x's second core.
    if B % 2 == 0 and B >= 2:
        TB, steps = B // 2, 2
    else:
        TB, steps = 1, B

    flops_per_sample = (2 * (2 * HW) * HW            # conv matmul
                        + 2 * (2 * r) * (2 * C)      # MLP layer 1
                        + 2 * C * (2 * r)            # MLP layer 2
                        + 4 * C * HW)                # merge
    cost = pl.CostEstimate(
        flops=B * flops_per_sample,
        transcendentals=B * (HW + C),
        bytes_accessed=3 * B * C * HW * 4 + (2 * HW * HW + 4 * r * C + 2 * C * r + 1) * 4,
    )

    kernel = functools.partial(sca_kernel, TB=TB)
    out_flat = pl.pallas_call(
        kernel,
        out_shape=jax.ShapeDtypeStruct((B, C, HW), e_h.dtype),
        grid=(steps,),
        in_specs=[
            pl.BlockSpec((TB, C, HW), lambda b: (b, 0, 0)),           # E_H (flat)
            pl.BlockSpec((TB, C, HW), lambda b: (b, 0, 0)),           # E_R (flat)
            pl.BlockSpec((2 * HW, HW), lambda b: (0, 0)),             # dense conv matrix
            pl.BlockSpec((2 * r, 2 * C), lambda b: (0, 0)),           # W1 block-diag
            pl.BlockSpec((C, 2 * r), lambda b: (0, 0)),               # [W2_avg | W2_max]
            pl.BlockSpec(memory_space=pltpu.MemorySpace.SMEM),        # folded BN bias
        ],
        out_specs=pl.BlockSpec((TB, C, HW), lambda b: (b, 0, 0)),
        compiler_params=pltpu.CompilerParams(
            dimension_semantics=("parallel",)),
        cost_estimate=cost,
    )(eh_flat, er_flat, conv_mat, w1bd, w2p, cb)
    return out_flat.reshape(B, C, H, W)


def sca_reference(e_h, e_r, params):
    """Pure-JAX reference mirroring the PyTorch forward (eval-mode BN)."""
    bn = params["bn"]
    eh_mean = jnp.mean(e_h, axis=1, keepdims=True)
    eh_max = jnp.max(e_h, axis=1, keepdims=True)
    cat = jnp.concatenate([eh_mean, eh_max], axis=1)
    conv = jax.lax.conv_general_dilated(
        cat, params["conv_w"], window_strides=(1, 1),
        padding=[(3, 3), (3, 3)],
        dimension_numbers=("NCHW", "OIHW", "NCHW"))
    bnorm = bn["gamma"] * (conv - bn["mean"]) / jnp.sqrt(bn["var"] + bn["eps"]) + bn["beta"]
    spatial_mask = jax.nn.sigmoid(bnorm)
    eh_att = e_h * spatial_mask

    avg = jnp.mean(e_r, axis=(2, 3))
    mx = jnp.max(e_r, axis=(2, 3))
    avg_out = jax.nn.relu(avg @ params["w1_avg"].T) @ params["w2_avg"].T
    max_out = jax.nn.relu(mx @ params["w1_max"].T) @ params["w2_max"].T
    cm = jax.nn.sigmoid(avg_out + max_out)[:, :, None, None]
    return eh_att + e_r * cm


if __name__ == "__main__":
    B, C, H, W = 4, 16, 16, 16
    key = jax.random.PRNGKey(0)
    k_eh, k_er, k_p = jax.random.split(key, 3)
    e_h = jax.random.normal(k_eh, (B, C, H, W), jnp.float32)
    e_r = jax.random.normal(k_er, (B, C, H, W), jnp.float32)
    params = make_params(C, k_p)

    out = sca_forward(e_h, e_r, params)
    out = jax.block_until_ready(out)

    ref = sca_reference(e_h, e_r, params)
    assert out.shape == (B, C, H, W)
    np.testing.assert_allclose(np.asarray(out), np.asarray(ref), rtol=2e-3, atol=2e-3)
    print("KERNEL_OK")
</pallas_src>

<mosaic_0001>
module attributes {stable_mosaic.version = 11 : i64} {
  func.func @sca_kernel(%arg0: i32, %arg1: memref<2x16x256xf32, #tpu.memory_space<vmem>>, %arg2: memref<2x16x256xf32, #tpu.memory_space<vmem>>, %arg3: memref<512x256xf32, #tpu.memory_space<vmem>>, %arg4: memref<4x32xf32, #tpu.memory_space<vmem>>, %arg5: memref<16x4xf32, #tpu.memory_space<vmem>>, %arg6: memref<1xf32, #tpu.memory_space<smem>>, %arg7: memref<2x16x256xf32, #tpu.memory_space<vmem>>) attributes {dimension_semantics = [#tpu.dimension_semantics<parallel>], iteration_bounds = array<i64: 2>, scalar_prefetch = 0 : i64, scratch_operands = 0 : i64, tpu.core_type = #tpu.core_type<tc>, window_params = [{transform_indices = @transform_0, window_bounds = array<i64: 2, 16, 256>}, {transform_indices = @transform_1, window_bounds = array<i64: 2, 16, 256>}, {pipeline_mode = #tpu.pipeline_mode<synchronous>, transform_indices = @transform_2, window_bounds = array<i64: 512, 256>}, {pipeline_mode = #tpu.pipeline_mode<synchronous>, transform_indices = @transform_3, window_bounds = array<i64: 4, 32>}, {pipeline_mode = #tpu.pipeline_mode<synchronous>, transform_indices = @transform_4, window_bounds = array<i64: 16, 4>}, {transform_indices = @transform_5, window_bounds = array<i64: 1>}, {transform_indices = @transform_6, window_bounds = array<i64: 2, 16, 256>}]} {
    %c0 = arith.constant 0 : index
    %c0_0 = arith.constant 0 : index
    %0 = vector.load %arg3[%c0, %c0_0] : memref<512x256xf32, #tpu.memory_space<vmem>>, vector<512x256xf32>
    %c0_1 = arith.constant 0 : index
    %c0_2 = arith.constant 0 : index
    %1 = vector.load %arg4[%c0_1, %c0_2] : memref<4x32xf32, #tpu.memory_space<vmem>>, vector<4x32xf32>
    %c0_3 = arith.constant 0 : index
    %c0_4 = arith.constant 0 : index
    %2 = vector.load %arg5[%c0_3, %c0_4] : memref<16x4xf32, #tpu.memory_space<vmem>>, vector<16x4xf32>
    %c0_5 = arith.constant 0 : index
    %3 = memref.load %arg6[%c0_5] : memref<1xf32, #tpu.memory_space<smem>>
    %c0_6 = arith.constant 0 : index
    %c0_7 = arith.constant 0 : index
    %c0_8 = arith.constant 0 : index
    %4 = vector.load %arg1[%c0_6, %c0_7, %c0_8] : memref<2x16x256xf32, #tpu.memory_space<vmem>>, vector<1x16x256xf32>
    %5 = vector.shape_cast %4 : vector<1x16x256xf32> to vector<16x256xf32>
    %c0_9 = arith.constant 0 : index
    %c0_10 = arith.constant 0 : index
    %c0_11 = arith.constant 0 : index
    %6 = vector.load %arg2[%c0_9, %c0_10, %c0_11] : memref<2x16x256xf32, #tpu.memory_space<vmem>>, vector<1x16x256xf32>
    %7 = vector.shape_cast %6 : vector<1x16x256xf32> to vector<16x256xf32>
    %cst = arith.constant dense<0.000000e+00> : vector<256xf32>
    %8 = vector.multi_reduction <add>, %5, %cst [0] : vector<16x256xf32> to vector<256xf32>
    %9 = vector.shape_cast %8 : vector<256xf32> to vector<1x256xf32>
    %cst_12 = arith.constant dense<0xFF800000> : vector<256xf32>
    %10 = vector.multi_reduction <maximumf>, %5, %cst_12 [0] : vector<16x256xf32> to vector<256xf32>
    %11 = vector.shape_cast %10 : vector<256xf32> to vector<1x256xf32>
    %12 = tpu.concatenate %9, %11 in 1 : vector<1x256xf32>, vector<1x256xf32> -> vector<1x512xf32>
    %cst_13 = arith.constant dense<0.000000e+00> : vector<1x256xf32>
    %13 = tpu.matmul %12, %0, %cst_13 {dimension_numbers = #tpu.dot_dimension_numbers<[1], [0], [0], [1], [0, 0, 1, 1], [], []>} : vector<1x512xf32>, vector<512x256xf32>, vector<1x256xf32> -> vector<1x256xf32>
    %14 = vector.broadcast %3 : f32 to vector<1x256xf32>
    %15 = arith.addf %13, %14 : vector<1x256xf32>
    %16 = arith.negf %15 : vector<1x256xf32>
    %17 = math.exp %16 : vector<1x256xf32>
    %cst_14 = arith.constant 1.000000e+00 : f32
    %18 = vector.broadcast %cst_14 : f32 to vector<1x256xf32>
    %19 = arith.addf %18, %17 : vector<1x256xf32>
    %20 = arith.divf %18, %19 : vector<1x256xf32>
    %cst_15 = arith.constant dense<0.000000e+00> : vector<16xf32>
    %21 = vector.multi_reduction <add>, %7, %cst_15 [1] : vector<16x256xf32> to vector<16xf32>
    %22 = vector.shape_cast %21 : vector<16xf32> to vector<16x1xf32>
    %cst_16 = arith.constant 2.560000e+02 : f32
    %23 = vector.broadcast %cst_16 : f32 to vector<16x1xf32>
    %24 = arith.divf %22, %23 : vector<16x1xf32>
    %cst_17 = arith.constant dense<0xFF800000> : vector<16xf32>
    %25 = vector.multi_reduction <maximumf>, %7, %cst_17 [1] : vector<16x256xf32> to vector<16xf32>
    %26 = vector.shape_cast %25 : vector<16xf32> to vector<16x1xf32>
    %27 = tpu.concatenate %24, %26 in 0 : vector<16x1xf32>, vector<16x1xf32> -> vector<32x1xf32>
    %cst_18 = arith.constant dense<0.000000e+00> : vector<4x1xf32>
    %28 = tpu.matmul %1, %27, %cst_18 {dimension_numbers = #tpu.dot_dimension_numbers<[1], [0], [0], [1], [0, 0, 1, 1], [], []>} : vector<4x32xf32>, vector<32x1xf32>, vector<4x1xf32> -> vector<4x1xf32>
    %cst_19 = arith.constant 0.000000e+00 : f32
    %29 = vector.broadcast %cst_19 : f32 to vector<4x1xf32>
    %30 = arith.maximumf %28, %29 : vector<4x1xf32>
    %cst_20 = arith.constant dense<0.000000e+00> : vector<16x1xf32>
    %31 = tpu.matmul %2, %30, %cst_20 {dimension_numbers = #tpu.dot_dimension_numbers<[1], [0], [0], [1], [0, 0, 1, 1], [], []>} : vector<16x4xf32>, vector<4x1xf32>, vector<16x1xf32> -> vector<16x1xf32>
    %32 = arith.negf %31 : vector<16x1xf32>
    %33 = math.exp %32 : vector<16x1xf32>
    %cst_21 = arith.constant 1.000000e+00 : f32
    %34 = vector.broadcast %cst_21 : f32 to vector<16x1xf32>
    %35 = arith.addf %34, %33 : vector<16x1xf32>
    %36 = arith.divf %34, %35 : vector<16x1xf32>
    %37 = vector.broadcast %20 : vector<1x256xf32> to vector<16x256xf32>
    %38 = arith.mulf %5, %37 : vector<16x256xf32>
    %39 = vector.broadcast %36 : vector<16x1xf32> to vector<16x256xf32>
    %40 = arith.mulf %7, %39 : vector<16x256xf32>
    %41 = arith.addf %38, %40 : vector<16x256xf32>
    %c0_22 = arith.constant 0 : index
    %c0_23 = arith.constant 0 : index
    %c0_24 = arith.constant 0 : index
    %42 = vector.load %arg7[%c0_22, %c0_23, %c0_24] : memref<2x16x256xf32, #tpu.memory_space<vmem>>, vector<1x16x256xf32>
    %43 = vector.shape_cast %42 : vector<1x16x256xf32> to vector<16x256xf32>
    %44 = vector.shape_cast %41 : vector<16x256xf32> to vector<1x16x256xf32>
    tpu.vector_store %arg7[%c0_22, %c0_23, %c0_24], %44 {strides = array<i32>} : memref<2x16x256xf32, #tpu.memory_space<vmem>>, vector<1x16x256xf32>,
    %c1 = arith.constant 1 : index
    %c0_25 = arith.constant 0 : index
    %c0_26 = arith.constant 0 : index
    %45 = vector.load %arg1[%c1, %c0_25, %c0_26] : memref<2x16x256xf32, #tpu.memory_space<vmem>>, vector<1x16x256xf32>
    %46 = vector.shape_cast %45 : vector<1x16x256xf32> to vector<16x256xf32>
    %c1_27 = arith.constant 1 : index
    %c0_28 = arith.constant 0 : index
    %c0_29 = arith.constant 0 : index
    %47 = vector.load %arg2[%c1_27, %c0_28, %c0_29] : memref<2x16x256xf32, #tpu.memory_space<vmem>>, vector<1x16x256xf32>
    %48 = vector.shape_cast %47 : vector<1x16x256xf32> to vector<16x256xf32>
    %cst_30 = arith.constant dense<0.000000e+00> : vector<256xf32>
    %49 = vector.multi_reduction <add>, %46, %cst_30 [0] : vector<16x256xf32> to vector<256xf32>
    %50 = vector.shape_cast %49 : vector<256xf32> to vector<1x256xf32>
    %cst_31 = arith.constant dense<0xFF800000> : vector<256xf32>
    %51 = vector.multi_reduction <maximumf>, %46, %cst_31 [0] : vector<16x256xf32> to vector<256xf32>
    %52 = vector.shape_cast %51 : vector<256xf32> to vector<1x256xf32>
    %53 = tpu.concatenate %50, %52 in 1 : vector<1x256xf32>, vector<1x256xf32> -> vector<1x512xf32>
    %cst_32 = arith.constant dense<0.000000e+00> : vector<1x256xf32>
    %54 = tpu.matmul %53, %0, %cst_32 {dimension_numbers = #tpu.dot_dimension_numbers<[1], [0], [0], [1], [0, 0, 1, 1], [], []>} : vector<1x512xf32>, vector<512x256xf32>, vector<1x256xf32> -> vector<1x256xf32>
    %55 = vector.broadcast %3 : f32 to vector<1x256xf32>
    %56 = arith.addf %54, %55 : vector<1x256xf32>
    %57 = arith.negf %56 : vector<1x256xf32>
    %58 = math.exp %57 : vector<1x256xf32>
    %cst_33 = arith.constant 1.000000e+00 : f32
    %59 = vector.broadcast %cst_33 : f32 to vector<1x256xf32>
    %60 = arith.addf %59, %58 : vector<1x256xf32>
    %61 = arith.divf %59, %60 : vector<1x256xf32>
    %cst_34 = arith.constant dense<0.000000e+00> : vector<16xf32>
    %62 = vector.multi_reduction <add>, %48, %cst_34 [1] : vector<16x256xf32> to vector<16xf32>
    %63 = vector.shape_cast %62 : vector<16xf32> to vector<16x1xf32>
    %cst_35 = arith.constant 2.560000e+02 : f32
    %64 = vector.broadcast %cst_35 : f32 to vector<16x1xf32>
    %65 = arith.divf %63, %64 : vector<16x1xf32>
    %cst_36 = arith.constant dense<0xFF800000> : vector<16xf32>
    %66 = vector.multi_reduction <maximumf>, %48, %cst_36 [1] : vector<16x256xf32> to vector<16xf32>
    %67 = vector.shape_cast %66 : vector<16xf32> to vector<16x1xf32>
    %68 = tpu.concatenate %65, %67 in 0 : vector<16x1xf32>, vector<16x1xf32> -> vector<32x1xf32>
    %cst_37 = arith.constant dense<0.000000e+00> : vector<4x1xf32>
    %69 = tpu.matmul %1, %68, %cst_37 {dimension_numbers = #tpu.dot_dimension_numbers<[1], [0], [0], [1], [0, 0, 1, 1], [], []>} : vector<4x32xf32>, vector<32x1xf32>, vector<4x1xf32> -> vector<4x1xf32>
    %cst_38 = arith.constant 0.000000e+00 : f32
    %70 = vector.broadcast %cst_38 : f32 to vector<4x1xf32>
    %71 = arith.maximumf %69, %70 : vector<4x1xf32>
    %cst_39 = arith.constant dense<0.000000e+00> : vector<16x1xf32>
    %72 = tpu.matmul %2, %71, %cst_39 {dimension_numbers = #tpu.dot_dimension_numbers<[1], [0], [0], [1], [0, 0, 1, 1], [], []>} : vector<16x4xf32>, vector<4x1xf32>, vector<16x1xf32> -> vector<16x1xf32>
    %73 = arith.negf %72 : vector<16x1xf32>
    %74 = math.exp %73 : vector<16x1xf32>
    %cst_40 = arith.constant 1.000000e+00 : f32
    %75 = vector.broadcast %cst_40 : f32 to vector<16x1xf32>
    %76 = arith.addf %75, %74 : vector<16x1xf32>
    %77 = arith.divf %75, %76 : vector<16x1xf32>
    %78 = vector.broadcast %61 : vector<1x256xf32> to vector<16x256xf32>
    %79 = arith.mulf %46, %78 : vector<16x256xf32>
    %80 = vector.broadcast %77 : vector<16x1xf32> to vector<16x256xf32>
    %81 = arith.mulf %48, %80 : vector<16x256xf32>
    %82 = arith.addf %79, %81 : vector<16x256xf32>
    %c1_41 = arith.constant 1 : index
    %c0_42 = arith.constant 0 : index
    %c0_43 = arith.constant 0 : index
    %83 = vector.load %arg7[%c1_41, %c0_42, %c0_43] : memref<2x16x256xf32, #tpu.memory_space<vmem>>, vector<1x16x256xf32>
    %84 = vector.shape_cast %83 : vector<1x16x256xf32> to vector<16x256xf32>
    %85 = vector.shape_cast %82 : vector<16x256xf32> to vector<1x16x256xf32>
    tpu.vector_store %arg7[%c1_41, %c0_42, %c0_43], %85 {strides = array<i32>} : memref<2x16x256xf32, #tpu.memory_space<vmem>>, vector<1x16x256xf32>,
    return
  }
  func.func @transform_0(%arg0: i32) -> (i32, i32, i32) {
    %c0_i32 = arith.constant 0 : i32
    %c0_i32_0 = arith.constant 0 : i32
    %c0_i32_1 = arith.constant 0 : i32
    return %arg0, %c0_i32, %c0_i32_0 : i32, i32, i32
  }
  func.func @transform_1(%arg0: i32) -> (i32, i32, i32) {
    %c0_i32 = arith.constant 0 : i32
    %c0_i32_0 = arith.constant 0 : i32
    %c0_i32_1 = arith.constant 0 : i32
    return %arg0, %c0_i32, %c0_i32_0 : i32, i32, i32
  }
  func.func @transform_2(%arg0: i32) -> (i32, i32) {
    %c0_i32 = arith.constant 0 : i32
    %c0_i32_0 = arith.constant 0 : i32
    %c0_i32_1 = arith.constant 0 : i32
    return %c0_i32, %c0_i32_0 : i32, i32
  }
  func.func @transform_3(%arg0: i32) -> (i32, i32) {
    %c0_i32 = arith.constant 0 : i32
    %c0_i32_0 = arith.constant 0 : i32
    %c0_i32_1 = arith.constant 0 : i32
    return %c0_i32, %c0_i32_0 : i32, i32
  }
  func.func @transform_4(%arg0: i32) -> (i32, i32) {
    %c0_i32 = arith.constant 0 : i32
    %c0_i32_0 = arith.constant 0 : i32
    %c0_i32_1 = arith.constant 0 : i32
    return %c0_i32, %c0_i32_0 : i32, i32
  }
  func.func @transform_5(%arg0: i32) -> i32 {
    %c0_i32 = arith.constant 0 : i32
    %c0_i32_0 = arith.constant 0 : i32
    return %c0_i32 : i32
  }
  func.func @transform_6(%arg0: i32) -> (i32, i32, i32) {
    %c0_i32 = arith.constant 0 : i32
    %c0_i32_0 = arith.constant 0 : i32
    %c0_i32_1 = arith.constant 0 : i32
    return %arg0, %c0_i32, %c0_i32_0 : i32, i32, i32
  }
}

</mosaic_0001>

<bundles_post_ra>
// kernel: tpu_custom_call.1
= control target key start
LH: loop header
LB: loop body
LE: loop exit
PB: predicated region body
PF: predicated region fallthrough
CT: control target
= control target key end

     0   :  { %s2714_s0 = inlined_call_operand.hbm [shape: f32[4,16,256], index: 0, kind: input, shape index: {}]   ;;  %s2715_s1 = inlined_call_operand.hbm [shape: f32[4,16,256], index: 1, kind: input, shape index: {}]   ;;  %s2716_s2 = inlined_call_operand.hbm [shape: f32[512,256], index: 2, kind: input, shape index: {}]   ;;  %s2717_s3 = inlined_call_operand.vmem [shape: f32[4,32], index: 3, kind: input, shape index: {}]   ;;  %s2718_s4 = inlined_call_operand.vmem [shape: f32[16,4], index: 4, kind: input, shape index: {}]   ;;  %s2719_s5 = inlined_call_operand.<no memory space> [shape: f32[1], index: 5, kind: input, shape index: {}]   ;;  %s2720_s6 = inlined_call_operand.hbm [shape: f32[4,16,256], index: 6, kind: output, shape index: {}]  }
   0x1   :  { %2811 = sst [smem:[#allocation98_spill]] %s2714_s0 }
   0x2   :  { %2812 = sst [smem:[#allocation99_spill]] %s2716_s2 }
   0x3   :  { %11 = sst [smem:[#allocation2]] %s2719_s5 }
   0x4   :  { %12 = vsyncpa [#allocation4], 0 }
   0x5   :  { %14 = vsyncpa [#allocation4 + $0x1], 0 }
   0x6   :  { %15 = vsyncpa [#allocation7], 0 }
   0x7   :  { %17 = vsyncpa [#allocation7 + $0x1], 0 }
   0x8   :  { %18 = vsyncpa [#allocation5], 0 }
   0x9   :  { %20 = vsyncpa [#allocation5 + $0x1], 0  ;;  %s1814_s23 = smov 0   ;;  %s1816_s24 = smov 0  }
   0xa   :  { %s1818_s25 = smov 0   ;;  %s1820_s26 = smov 0  }
   0xb LB: > { %2813 = sst [smem:[#allocation14_spill]] %s1759_s25  ;;  %s1835_s5 = sadd.s32 4294967295, %s1763_s26   ;;  %s1763_s26 = sphi %s1820_s26, %s3000_s26   ;;  %s1759_s25 = sphi %s1818_s25, %s2997_s25   ;;  %s1755_s24 = sphi %s1816_s24, %s2999_s24   ;;  %s1751_s23 = sphi %s1814_s23, %s2998_s23  }
   0xc   : > { %s1397_s27 = sadd.s32 4294967294, %s1763_s26   ;;  %p46_p0 = scmp.ne.s32.totalorder %s1755_s24, %s1751_s23 }
   0xd   : > { %p2725_p1 = scmp.eq.s32.totalorder %s1835_s5, 0  ;;  %p186_p3 = scmp.eq.s32.totalorder %s1397_s27, 1 }
   0xe   : > { %p1398_p5 = scmp.ge.s32.totalorder %s1763_s26, 1  ;;  %p193_p7 = scmp.lt.s32.totalorder %s1763_s26, 3 }
   0xf   : > { %p1844_p4 = por %p2725_p1, %p46_p0  ;;  %p1849_p6 = por %p186_p3, %p46_p0 }
  0x10   : > { %p1854_p8 = pnand %p1398_p5, %p193_p7  ;;  %s1765_s7 = smov [#allocation8]  }
  0x11   : > { %s2814_s28 = scalar_select %p1844_p4, 1, 0 }
  0x12   : > { %s2815_s29 = scalar_select %p1849_p6, 1, 0 }
  0x13   : > { %s205_s8 = sshll.u32 %s1765_s7, 4  ;;  %p1512_p9 = pneg %p1854_p8  ;;  %s206_s8 = int_to_ptr.vmem [resolvable:$true] %s205_s8 }
  0x14   : > { %s1868_s10 = sadd.s32 1, %s1763_s26   ;;  %s33_s11 = sadd.s32 1, %s1759_s25 }
  0x15   : > { %p1863_p11 = pnand %p1512_p9, %p2725_p1  ;;  %s30_s12 = ssub.s32 %s1763_s26, %s1868_s10 }
  0x16   : > { %s1620_s13 = scalar_lea.vmem %s206_s8, 16384  ;;  %p1628_p5 = scmp.lt.s32.totalorder %s206_s8, %s206_s8 }
  0x17   : > { %p1611_p12 = pneg %p1863_p11  ;;  %p1621_p13 = scmp.ne.s32.totalorder %s206_s8, %s1620_s13 }
  0x18   : > { %p1629_p7 = scmp.lt.s32.totalorder %s1620_s13, %s1620_s13 }
  0x19   : > { %p1623_p0 = pnand %p1621_p13, %p1611_p12 }
  0x1a   : > { %p1630_p10 = por %p1629_p7, %p1628_p5 }
  0x1b   : > { %p1624_p3 = pneg %p1623_p0 }
  0x1d   : > { %p1631_p2 = pnand %p1630_p10, %p1624_p3 }
  0x1f   : > { %1634 = shalt.err (!%p1631_p2)
}
  0x20   : > { %s2721_s14 = smov 256   ;;  %s2723_s15 = smov 16  }
  0x21   : > { %s2818_s2 = sld [smem:[#allocation99_spill]]  ;;  %p31_p2 = scmp.eq.s32.totalorder %s30_s12, 0 }
  0x22   : > { %p40_p9 = scmp.ne.s32.totalorder %s1759_s25, %s1755_s24  ;;  %p41_p10 = scmp.eq.s32.totalorder %s1763_s26, 0 }
  0x23   : > { %p1528_p12 = scmp.lt.s32.totalorder %s1763_s26, 2  ;;  %p2820_p0 = scmp.eq.s32.totalorder %s1835_s5, 1 }
  0x24   : > { %s1888_s18 = scalar_select %p31_p2, %s1759_s25, %s33_s11  }
  0x25   : > { %p42_p13 = por %p41_p10, %p40_p9  ;;  %p1892_p3 = por %p2820_p0, %p40_p9 }
  0x26   : > { %2819 = sst [smem:[#allocation15_spill]] %s1888_s18  ;;  %s228_s20 = sand.u32 1, %s1759_s25  }
  0x27   : > { %1515 = dma.hbm_to_vmem [thread:$0]  (!%p1863_p11), %s2818_s2, 16384, %s206_s8, [#allocation7], %s2721_s14, %s2721_s14, %s2723_s15  }
  0x28   : > { %s2821_s19 = scalar_select %p1892_p3, 1, 0 }
  0x29   : > { %s1449_s21 = sshll.u32 %s1763_s26, 10  ;;  %s1898_s22 = sshll.u32 %s228_s20, 6 }
  0x2a   : > { %s2822_s0 = sld [smem:[#allocation98_spill]]  ;;  %s232_s9 = scalar_lea.vmem [#allocation3], %s1898_s22 }
  0x2b   : > { %s240_s11 = sshll.u32 %s232_s9, 4  ;;  %p1906_p11 = pnand %p1528_p12, %p42_p13  ;;  %s1910_s11 = int_to_ptr.vmem [resolvable:$true] %s240_s11 }
  0x2c   : > { %s1915_s17 = scalar_lea.hbm %s2715_s1, %s1449_s21  ;;  %s1917_s27 = scalar_lea.sflag [#allocation4], %s228_s20 }
  0x2d   : > { %p1637_p7 = pneg %p1906_p11 }
  0x30   : > { %s1903_s8 = scalar_lea.hbm %s2822_s0, %s1449_s21  ;;  %s1640_s15 = scalar_lea.hbm %s2822_s0, 2048 }
  0x31   : > { %s1635_s7 = scalar_lea.hbm %s1903_s8, 1024  ;;  %p1641_p10 = scmp.lt.s32.totalorder %s1903_s8, %s2822_s0 }
  0x32   : > { %p1636_p5 = scmp.ne.s32.totalorder %s1903_s8, %s1635_s7  ;;  %p1642_p12 = scmp.lt.s32.totalorder %s1640_s15, %s1635_s7 }
  0x34   : > { %p1638_p2 = pnand %p1637_p7, %p1636_p5  ;;  %p1643_p13 = por %p1642_p12, %p1641_p10 }
  0x36   : > { %p1639_p9 = pneg %p1638_p2 }
  0x38   : > { %p1644_p0 = pnand %p1643_p13, %p1639_p9 }
  0x3a   : > { %1647 = shalt.err (!%p1644_p0)
}
  0x3b   : > { %s1648_s20 = scalar_lea.vmem %s1910_s11, 1024  ;;  %s1768_s14 = smov [#allocation3]  }
  0x3c   : > { %p1649_p1 = scmp.ne.s32.totalorder %s1910_s11, %s1648_s20  ;;  %s1653_s21 = sshll.u32 %s1768_s14, 4  ;;  %s1654_s21 = int_to_ptr.vmem [resolvable:$false] %s1653_s21 }
  0x3d   : > { %s1655_s13 = scalar_lea.vmem %s1654_s21, 2048  ;;  %p1656_p6 = scmp.lt.s32.totalorder %s1910_s11, %s1654_s21 }
  0x3e   : > { %p1651_p5 = pnand %p1649_p1, %p1637_p7  ;;  %p1657_p3 = scmp.lt.s32.totalorder %s1655_s13, %s1648_s20 }
  0x40   : > { %p1652_p2 = pneg %p1651_p5  ;;  %p1658_p4 = por %p1657_p3, %p1656_p6 }
  0x42   : > { %p1659_p10 = pnand %p1658_p4, %p1652_p2 }
  0x44   : > { %1662 = shalt.err (!%p1659_p10)
}
  0x45   : > { %s2824_s2 = smov 16   ;;  %s2825_s15 = smov 256  }
  0x46   : > { %1519 = dma.hbm_to_vmem [thread:$0]  (!%p1906_p11), %s1903_s8, 1024, %s1910_s11, %s1917_s27, %s2825_s15, %s2825_s15, %s2824_s2  }
  0x47   : > { %s254_s18 = scalar_lea.vmem [#allocation6], %s1898_s22  ;;  %s250_s7 = sand.u32 1, %s1763_s26  }
  0x48   : > { %s262_s16 = sshll.u32 %s254_s18, 4  ;;  %s251_s9 = scalar_lea.sflag [#allocation7], %s250_s7  ;;  %s1949_s16 = int_to_ptr.vmem [resolvable:$true] %s262_s16 }
  0x49   : > { %s1663_s20 = scalar_lea.hbm %s1915_s17, 1024  ;;  %s1668_s13 = scalar_lea.hbm %s2715_s1, 2048 }
  0x4a   : > { %p1664_p1 = scmp.ne.s32.totalorder %s1915_s17, %s1663_s20  ;;  %p1669_p3 = scmp.lt.s32.totalorder %s1915_s17, %s2715_s1 }
  0x4b   : > { %p1670_p9 = scmp.lt.s32.totalorder %s1668_s13, %s1663_s20 }
  0x4c   : > { %p1666_p4 = pnand %p1664_p1, %p1637_p7 }
  0x4d   : > { %p1671_p12 = por %p1670_p9, %p1669_p3 }
  0x4e   : > { %p1667_p6 = pneg %p1666_p4 }
  0x50   : > { %p1672_p13 = pnand %p1671_p12, %p1667_p6 }
  0x52   : > { %1675 = shalt.err (!%p1672_p13)
}
  0x53   : > { %s1676_s22 = scalar_lea.vmem %s1949_s16, 1024  ;;  %s1769_s8 = smov [#allocation6]  }
  0x54   : > { %p1677_p0 = scmp.ne.s32.totalorder %s1949_s16, %s1676_s22  ;;  %s1681_s11 = sshll.u32 %s1769_s8, 4  ;;  %s1682_s11 = int_to_ptr.vmem [resolvable:$false] %s1681_s11 }
  0x55   : > { %s1683_s27 = scalar_lea.vmem %s1682_s11, 2048  ;;  %p1684_p10 = scmp.lt.s32.totalorder %s1949_s16, %s1682_s11 }
  0x56   : > { %p1679_p5 = pnand %p1677_p0, %p1637_p7  ;;  %p1685_p1 = scmp.lt.s32.totalorder %s1683_s27, %s1676_s22 }
  0x58   : > { %p1680_p2 = pneg %p1679_p5  ;;  %p1686_p4 = por %p1685_p1, %p1684_p10 }
  0x5a   : > { %p1687_p3 = pnand %p1686_p4, %p1680_p2 }
  0x5c   : > { %1690 = shalt.err (!%p1687_p3)
}
  0x5d   : > { %1522 = dma.hbm_to_vmem [thread:$0]  (!%p1906_p11), %s1915_s17, 1024, %s1949_s16, %s251_s9, %s2825_s15, %s2825_s15, %s2824_s2  }
  0x5e   : > { %274 = sbr.rel (%p1854_p8) target bundleno = 1098 (0x44a), region = 44 }
  0x63   : > { %s1979_s0 = sand.u32 1, %s1755_s24   ;;  %p2826_p7 = scmp.ne.s32.totalorder %s2814_s28, 0 }
  0x64   : > { %s1982_s25 = sshll.u32 %s1979_s0, 6  ;;  %s277_s18 = scalar_lea.sflag [#allocation4], %s1979_s0 }
  0x65   : > { %s1986_s12 = scalar_lea.vmem [#allocation3], %s1982_s25 }
  0x66   : > { %1734 = dma.done.wait (%p2826_p7), %s277_s18, 1024  }
  0x67   : > { %1736 = vsyncadd (%p2826_p7), %s277_s18, 4294966272  ;;  %s285_s30 = sand.u32 1, %s1835_s5   ;;  %s1994_s2 = scalar_lea.vmem [#allocation6], %s1982_s25 }
  0x68   : > { %s286_s17 = scalar_lea.sflag [#allocation7], %s285_s30 }
  0x69   : > { %1738 = dma.done.wait (%p2826_p7), %s286_s17, 1024  }
  0x6a   : > { %1740 = vsyncadd (%p2826_p7), %s286_s17, 4294966272  ;;  %p2827_p8 = scmp.eq.s32.totalorder %s1835_s5, 0 }
  0x6c   : > { %1742 = dma.done.wait (%p2827_p8), [#allocation7], 16384   ;;  %p2828_p11 = pmov %p2827_p8 }
  0x6d   : > { %v468_v0 = vld [vmem:[%s1994_s2 + $0x10] sm:$0xff]  ;;  %v469_v1 = vld [vmem:[%s1994_s2 + $0x18] sm:$0xff]  ;;  %v466_v2 = vld [vmem:[%s1994_s2] sm:$0xff]  ;;  %vm1771_vm0 = vmmov 0   ;;  %vm668_vm1 = vcmask 261120   ;;  %vm743_vm2 = vcmask 31744  }
  0x6e   : > { %1744 = vsyncadd (%p2828_p11), [#allocation7], 4294950912  ;;  %v665_v3 = vmax.f32 %v468_v0, %v469_v1  ;;  %v467_v4 = vld [vmem:[%s1994_s2 + $0x8] sm:$0xff]  ;;  %v2008_v5 = vld [vmem:[#allocation8 + $0xf8] sm:$0xff]  ;;  %v656_v11 = vadd.f32 %v469_v1, %v468_v0  ;;  %s461_s9 = sld [smem:[#allocation2]]  ;;  %vm750_vm3 = vcmask 1043456  }
  0x6f   : > { %2829 = vst [vmem:[#allocation16_spill] sm:$0xff] %v2008_v5  ;;  %v2010_v6 = vld [vmem:[#allocation8 + $0xf0] sm:$0xff]  ;;  %v662_v7 = vmax.f32 %v466_v2, %v467_v4  ;;  %499 = vmatprep.subr.mxu0 %v2008_v5  ;;  %v2013_v8 = vld [vmem:[#allocation8 + $0xe8] sm:$0xff]  ;;  %v2015_v9 = vld [vmem:[#allocation8 + $0xe0] sm:$0xff]  ;;  %v653_v14 = vadd.f32 %v467_v4, %v466_v2  ;;  %s2642_s21 = scalar_lea.vmem [#allocation9], %s1982_s25  ;;  %s1453_s13 = sshll.u32 %s1835_s5, 10 }
  0x70   : > { %2830 = vst [vmem:[#allocation17_spill] sm:$0xff] %v2010_v6  ;;  %2831 = vst [vmem:[#allocation18_spill] sm:$0xff] %v2013_v8  ;;  %v2017_v10 = vld [vmem:[#allocation8 + $0x2f8] sm:$0xff]  ;;  %666 = vmax.xlane.f32.xlu0 %v665_v3  ;;  %500 = vmatpush1.msra.mxu0 %v2010_v6  ;;  %v2022_v13 = vld [vmem:[#allocation8 + $0x2f0] sm:$0xff]  ;;  %s1292_s22 = sshll.u32 %s2642_s21, 4  ;;  %s2667_s27 = scalar_lea.hbm %s2720_s6, %s1453_s13  ;;  %s2669_s22 = int_to_ptr.vmem [resolvable:$true] %s1292_s22 }
  0x71   : > { %2832 = vst [vmem:[#allocation19_spill] sm:$0xff] %v2015_v9  ;;  %v2020_v12 = vld [vmem:[#allocation8 + $0xd8] sm:$0xff]  ;;  %663 = vmax.xlane.f32.xlu1 %v662_v7  ;;  %501 = vmatprep.subr.mxu0 %v2013_v8  ;;  %v2025_v15 = vld [vmem:[#allocation8 + $0xd0] sm:$0xff]  ;;  %v2029_v16 = vld [vmem:[#allocation8 + $0x2e8] sm:$0xff]  ;;  %s1278_s5 = scalar_lea.sflag [#allocation5], %s1979_s0  ;;  %s1691_s25 = scalar_lea.vmem %s2669_s22, 1024 }
  0x72   : > { %2833 = vst [vmem:[#allocation20_spill] sm:$0xff] %v2020_v12  ;;  %2834 = vst [vmem:[#allocation21_spill] sm:$0xff] %v2025_v15  ;;  %502 = vmatpush1.msra.mxu0 %v2015_v9  ;;  %570 = vmatprep.subr.mxu1 %v2017_v10  ;;  %v2033_v17 = vld [vmem:[#allocation8 + $0xc8] sm:$0xff]  ;;  %v2035_v18 = vld [vmem:[#allocation8 + $0x2e0] sm:$0xff]  ;;  %p1692_p6 = scmp.ne.s32.totalorder %s2669_s22, %s1691_s25  ;;  %p2993_p9 = scmp.ne.s32.totalorder %s2821_s19, 0 }
  0x73   : > { %503 = vmatprep.subr.mxu0 %v2020_v12  ;;  %571 = vmatpush1.msra.mxu1 %v2022_v13  ;;  %2835 = vst [vmem:[#allocation22_spill] sm:$0xff] %v2033_v17  ;;  %v2038_v19 = vld [vmem:[#allocation8 + $0xc0] sm:$0xff]  ;;  %v2040_v20 = vld [vmem:[#allocation8 + $0x2d8] sm:$0xff]  ;;  %v2045_v22 = vld [vmem:[#allocation8 + $0x2d0] sm:$0xff]  ;;  %s1773_s18 = smov [#allocation9]  }
  0x74   : > { %657 = vadd.xlane.f32.xlu0 %v656_v11  ;;  %504 = vmatpush1.msra.mxu0 %v2025_v15  ;;  %2836 = vst [vmem:[#allocation23_spill] sm:$0xff] %v2038_v19  ;;  %v2043_v21 = vld [vmem:[#allocation8 + $0xb8] sm:$0xff]  ;;  %v2049_v23 = vld [vmem:[#allocation8 + $0xb0] sm:$0xff]  ;;  %v2051_v24 = vld [vmem:[#allocation8 + $0x2c8] sm:$0xff]  ;;  %p1693_p12 = pnand %p1692_p6, %p2993_p9 }
  0x75   : > { %654 = vadd.xlane.f32.xlu1 %v653_v14  ;;  %572 = vmatprep.subr.mxu1 %v2029_v16  ;;  %2837 = vst [vmem:[#allocation24_spill] sm:$0xff] %v2043_v21  ;;  %2838 = vst [vmem:[#allocation25_spill] sm:$0xff] %v2049_v23  ;;  %v2055_v25 = vld [vmem:[#allocation8 + $0xa8] sm:$0xff]  ;;  %v2057_v26 = vld [vmem:[#allocation8 + $0x2c0] sm:$0xff] }
  0x76   : > { %505 = vmatprep.subr.mxu0 %v2033_v17  ;;  %573 = vmatpush1.msra.mxu1 %v2035_v18  ;;  %2839 = vst [vmem:[#allocation26_spill] sm:$0xff] %v2055_v25  ;;  %v2061_v27 = vld [vmem:[#allocation8 + $0xa0] sm:$0xff]  ;;  %v2063_v28 = vld [vmem:[#allocation8 + $0x2b8] sm:$0xff]  ;;  %v2069_v30 = vld [vmem:[#allocation8 + $0x2b0] sm:$0xff]  ;;  %p1694_p13 = pneg %p1693_p12 }
  0x77   : > { %506 = vmatpush1.msra.mxu0 %v2038_v19  ;;  %574 = vmatprep.subr.mxu1 %v2040_v20  ;;  %2840 = vst [vmem:[#allocation27_spill] sm:$0xff] %v2061_v27  ;;  %v2067_v29 = vld [vmem:[#allocation8 + $0x98] sm:$0xff]  ;;  %v2073_v31 = vld [vmem:[#allocation8 + $0x90] sm:$0xff]  ;;  %v2075_v32 = vld [vmem:[#allocation8 + $0x2a8] sm:$0xff] }
  0x78   : > { %507 = vmatprep.subr.mxu0 %v2043_v21  ;;  %575 = vmatpush1.msra.mxu1 %v2045_v22  ;;  %2841 = vst [vmem:[#allocation28_spill] sm:$0xff] %v2067_v29  ;;  %2842 = vst [vmem:[#allocation29_spill] sm:$0xff] %v2073_v31  ;;  %v2079_v33 = vld [vmem:[#allocation8 + $0x88] sm:$0xff]  ;;  %v2081_v34 = vld [vmem:[#allocation8 + $0x2a0] sm:$0xff] }
  0x79   : > { %508 = vmatpush1.msra.mxu0 %v2049_v23  ;;  %576 = vmatprep.subr.mxu1 %v2051_v24  ;;  %2843 = vst [vmem:[#allocation30_spill] sm:$0xff] %v2079_v33  ;;  %v2085_v35 = vld [vmem:[#allocation8 + $0x80] sm:$0xff]  ;;  %v2087_v36 = vld [vmem:[#allocation8 + $0x298] sm:$0xff]  ;;  %v2093_v38 = vld [vmem:[#allocation8 + $0x290] sm:$0xff] }
  0x7a   : > { %509 = vmatprep.subr.mxu0 %v2055_v25  ;;  %577 = vmatpush1.msra.mxu1 %v2057_v26  ;;  %2844 = vst [vmem:[#allocation31_spill] sm:$0xff] %v2085_v35  ;;  %v2091_v37 = vld [vmem:[#allocation8 + $0x78] sm:$0xff]  ;;  %v2097_v39 = vld [vmem:[#allocation8 + $0x70] sm:$0xff]  ;;  %v2099_v40 = vld [vmem:[#allocation8 + $0x288] sm:$0xff] }
  0x7b   : > { %510 = vmatpush1.msra.mxu0 %v2061_v27  ;;  %578 = vmatprep.subr.mxu1 %v2063_v28  ;;  %2845 = vst [vmem:[#allocation32_spill] sm:$0xff] %v2091_v37  ;;  %2846 = vst [vmem:[#allocation33_spill] sm:$0xff] %v2097_v39  ;;  %v2103_v41 = vld [vmem:[#allocation8 + $0x68] sm:$0xff]  ;;  %v2105_v42 = vld [vmem:[#allocation8 + $0x280] sm:$0xff] }
  0x7c   : > { %511 = vmatprep.subr.mxu0 %v2067_v29  ;;  %579 = vmatpush1.msra.mxu1 %v2069_v30  ;;  %2847 = vst [vmem:[#allocation34_spill] sm:$0xff] %v2103_v41  ;;  %v2109_v43 = vld [vmem:[#allocation8 + $0x60] sm:$0xff]  ;;  %v2111_v44 = vld [vmem:[#allocation8 + $0x278] sm:$0xff]  ;;  %v2117_v46 = vld [vmem:[#allocation8 + $0x270] sm:$0xff] }
  0x7d   : > { %512 = vmatpush1.msra.mxu0 %v2073_v31  ;;  %580 = vmatprep.subr.mxu1 %v2075_v32  ;;  %2848 = vst [vmem:[#allocation35_spill] sm:$0xff] %v2109_v43  ;;  %v2115_v45 = vld [vmem:[#allocation8 + $0x58] sm:$0xff]  ;;  %v2121_v47 = vld [vmem:[#allocation8 + $0x50] sm:$0xff]  ;;  %v2123_v48 = vld [vmem:[#allocation8 + $0x268] sm:$0xff] }
  0x7e   : > { %513 = vmatprep.subr.mxu0 %v2079_v33  ;;  %581 = vmatpush1.msra.mxu1 %v2081_v34  ;;  %2849 = vst [vmem:[#allocation36_spill] sm:$0xff] %v2115_v45  ;;  %2850 = vst [vmem:[#allocation37_spill] sm:$0xff] %v2121_v47  ;;  %v2127_v49 = vld [vmem:[#allocation8 + $0x48] sm:$0xff]  ;;  %v2129_v50 = vld [vmem:[#allocation8 + $0x260] sm:$0xff] }
  0x7f   : > { %514 = vmatpush1.msra.mxu0 %v2085_v35  ;;  %582 = vmatprep.subr.mxu1 %v2087_v36  ;;  %2851 = vst [vmem:[#allocation38_spill] sm:$0xff] %v2127_v49  ;;  %v2133_v51 = vld [vmem:[#allocation8 + $0x40] sm:$0xff]  ;;  %v2135_v52 = vld [vmem:[#allocation8 + $0x258] sm:$0xff]  ;;  %v2141_v54 = vld [vmem:[#allocation8 + $0x250] sm:$0xff] }
  0x80   : > { %515 = vmatprep.subr.mxu0 %v2091_v37  ;;  %583 = vmatpush1.msra.mxu1 %v2093_v38  ;;  %2852 = vst [vmem:[#allocation39_spill] sm:$0xff] %v2133_v51  ;;  %v2139_v53 = vld [vmem:[#allocation8 + $0x38] sm:$0xff]  ;;  %v2145_v55 = vld [vmem:[#allocation8 + $0x30] sm:$0xff]  ;;  %v2147_v56 = vld [vmem:[#allocation8 + $0x248] sm:$0xff] }
  0x81   : > { %516 = vmatpush1.msra.mxu0 %v2097_v39  ;;  %584 = vmatprep.subr.mxu1 %v2099_v40  ;;  %2853 = vst [vmem:[#allocation40_spill] sm:$0xff] %v2139_v53  ;;  %2854 = vst [vmem:[#allocation41_spill] sm:$0xff] %v2145_v55  ;;  %v2151_v57 = vld [vmem:[#allocation8 + $0x28] sm:$0xff]  ;;  %v2153_v58 = vld [vmem:[#allocation8 + $0x240] sm:$0xff] }
  0x82   : > { %517 = vmatprep.subr.mxu0 %v2103_v41  ;;  %585 = vmatpush1.msra.mxu1 %v2105_v42  ;;  %2855 = vst [vmem:[#allocation42_spill] sm:$0xff] %v2151_v57  ;;  %v2157_v59 = vld [vmem:[#allocation8 + $0x20] sm:$0xff]  ;;  %v2159_v60 = vld [vmem:[#allocation8 + $0x238] sm:$0xff]  ;;  %v2165_v62 = vld [vmem:[#allocation8 + $0x230] sm:$0xff] }
  0x83   : > { %518 = vmatpush1.msra.mxu0 %v2109_v43  ;;  %586 = vmatprep.subr.mxu1 %v2111_v44  ;;  %2856 = vst [vmem:[#allocation43_spill] sm:$0xff] %v2157_v59  ;;  %v2163_v61 = vld [vmem:[#allocation8 + $0x18] sm:$0xff]  ;;  %v2169_v63 = vld [vmem:[#allocation8 + $0x10] sm:$0xff]  ;;  %v2171_v0 = vld [vmem:[#allocation8 + $0x228] sm:$0xff] }
  0x84   : > { %519 = vmatprep.subr.mxu0 %v2115_v45  ;;  %587 = vmatpush1.msra.mxu1 %v2117_v46  ;;  %2857 = vst [vmem:[#allocation44_spill] sm:$0xff] %v2163_v61  ;;  %2858 = vst [vmem:[#allocation45_spill] sm:$0xff] %v2169_v63  ;;  %v2175_v1 = vld [vmem:[#allocation8 + $0x8] sm:$0xff]  ;;  %v2177_v2 = vld [vmem:[#allocation8 + $0x220] sm:$0xff] }
  0x85   : > { %520 = vmatpush1.msra.mxu0 %v2121_v47  ;;  %588 = vmatprep.subr.mxu1 %v2123_v48  ;;  %2859 = vst [vmem:[#allocation46_spill] sm:$0xff] %v2175_v1  ;;  %v2181_v3 = vld [vmem:[#allocation8] sm:$0xff]  ;;  %v2183_v4 = vld [vmem:[#allocation8 + $0x218] sm:$0xff]  ;;  %v2189_v11 = vld [vmem:[#allocation8 + $0x210] sm:$0xff] }
  0x86   : > { %521 = vmatprep.subr.mxu0 %v2127_v49  ;;  %589 = vmatpush1.msra.mxu1 %v2129_v50  ;;  %2860 = vst [vmem:[#allocation47_spill] sm:$0xff] %v2181_v3  ;;  %v2187_v7 = vld [vmem:[#allocation8 + $0x1f8] sm:$0xff]  ;;  %v2193_v14 = vld [vmem:[#allocation8 + $0x1f0] sm:$0xff]  ;;  %v2229_v49 = vld [vmem:[#allocation8 + $0x1c0] sm:$0xff] }
  0x87   : > { %522 = vmatpush1.msra.mxu0 %v2133_v51  ;;  %590 = vmatprep.subr.mxu1 %v2135_v52  ;;  %2861 = vst [vmem:[#allocation48_spill] sm:$0xff] %v2187_v7  ;;  %2862 = vst [vmem:[#allocation49_spill] sm:$0xff] %v2193_v14  ;;  %v2223_v51 = vld [vmem:[#allocation8 + $0x1c8] sm:$0xff]  ;;  %v2237_v47 = vld [vmem:[#allocation8 + $0x3d0] sm:$0xff] }
  0x88   : > { %523 = vmatprep.subr.mxu0 %v2139_v53  ;;  %591 = vmatpush1.msra.mxu1 %v2141_v54  ;;  %v2217_v53 = vld [vmem:[#allocation8 + $0x1d0] sm:$0xff]  ;;  %2867 = vst [vmem:[#allocation54_spill] sm:$0xff] %v2223_v51  ;;  %2868 = vst [vmem:[#allocation55_spill] sm:$0xff] %v2229_v49  ;;  %v2243_v45 = vld [vmem:[#allocation8 + $0x3c8] sm:$0xff] }
  0x89   : > { %524 = vmatpush1.msra.mxu0 %v2145_v55  ;;  %592 = vmatprep.subr.mxu1 %v2147_v56  ;;  %v2211_v55 = vld [vmem:[#allocation8 + $0x1d8] sm:$0xff]  ;;  %2866 = vst [vmem:[#allocation53_spill] sm:$0xff] %v2217_v53  ;;  %v2245_v43 = vld [vmem:[#allocation8 + $0x1a8] sm:$0xff]  ;;  %v2251_v41 = vld [vmem:[#allocation8 + $0x1a0] sm:$0xff] }
  0x8a   : > { %525 = vmatprep.subr.mxu0 %v2151_v57  ;;  %593 = vmatpush1.msra.mxu1 %v2153_v58  ;;  %v2205_v57 = vld [vmem:[#allocation8 + $0x1e0] sm:$0xff]  ;;  %2865 = vst [vmem:[#allocation52_spill] sm:$0xff] %v2211_v55  ;;  %2871 = vst [vmem:[#allocation58_spill] sm:$0xff] %v2245_v43  ;;  %v2253_v39 = vld [vmem:[#allocation8 + $0x3b8] sm:$0xff] }
  0x8b   : > { %526 = vmatpush1.msra.mxu0 %v2157_v59  ;;  %594 = vmatprep.subr.mxu1 %v2159_v60  ;;  %v2199_v59 = vld [vmem:[#allocation8 + $0x1e8] sm:$0xff]  ;;  %2864 = vst [vmem:[#allocation51_spill] sm:$0xff] %v2205_v57  ;;  %2872 = vst [vmem:[#allocation59_spill] sm:$0xff] %v2251_v41  ;;  %v2263_v35 = vld [vmem:[%s1986_s12 + $0x18] sm:$0xff] }
  0x8c   : > { %527 = vmatprep.subr.mxu0 %v2163_v61  ;;  %595 = vmatpush1.msra.mxu1 %v2165_v62  ;;  %v2195_v61 = vld [vmem:[#allocation8 + $0x208] sm:$0xff]  ;;  %2863 = vst [vmem:[#allocation50_spill] sm:$0xff] %v2199_v59  ;;  %2875 = vst [vmem:[#allocation62_spill] sm:$0xff] %v2263_v35  ;;  %v2272_v31 = vld [vmem:[%s1986_s12] sm:$0xff] }
  0x8d   : > { %528 = vmatpush1.msra.mxu0 %v2169_v63  ;;  %596 = vmatprep.subr.mxu1 %v2171_v0  ;;  %v2201_v63 = vld [vmem:[#allocation8 + $0x200] sm:$0xff]  ;;  %v2260_v37 = vld [vmem:[%s1986_s12 + $0x8] sm:$0xff]  ;;  %2876 = vst [vmem:[#allocation63_spill] sm:$0xff] %v2272_v31  ;;  %v2281_v27 = vld [vmem:[#allocation8 + $0x190] sm:$0xff] }
  0x8e   : > { %529 = vmatprep.subr.mxu0 %v2175_v1  ;;  %597 = vmatpush1.msra.mxu1 %v2177_v2  ;;  %v2207_v1 = vld [vmem:[#allocation8 + $0x3f8] sm:$0xff]  ;;  %2874 = vst [vmem:[#allocation61_spill] sm:$0xff] %v2260_v37  ;;  %v477_v33 = vadd.f32 %v2263_v35, %v2260_v37  ;;  %v491_v29 = vmax.f32 %v2260_v37, %v2263_v35  ;;  %2878 = vst [vmem:[#allocation65_spill] sm:$0xff] %v2281_v27  ;;  %v2291_v21 = vld [vmem:[#allocation8 + $0x188] sm:$0xff] }
  0x8f   : > { %530 = vmatpush1.msra.mxu0 %v2181_v3  ;;  %598 = vmatprep.subr.mxu1 %v2183_v4  ;;  %v2213_v3 = vld [vmem:[#allocation8 + $0x3f0] sm:$0xff]  ;;  %2879 = vst [vmem:[#allocation66_spill] sm:$0xff] %v2291_v21  ;;  %v2293_v37 = vld [vmem:[#allocation8 + $0x3a0] sm:$0xff]  ;;  %v2299_v17 = vld [vmem:[#allocation8 + $0x398] sm:$0xff] }
  0x90   : > { %531 = vmatprep.subr.mxu0 %v2187_v7  ;;  %599 = vmatpush1.msra.mxu1 %v2189_v11  ;;  %v2219_v7 = vld [vmem:[#allocation8 + $0x3e8] sm:$0xff]  ;;  %2880 = vst [vmem:[#allocation67_spill] sm:$0xff] %v2293_v37  ;;  %v478_v35 = vrot.slane %v477_v33, 4  ;;  %v2297_v19 = vld [vmem:[#allocation8 + $0x180] sm:$0xff]  ;;  %2882 = vst [vmem:[#allocation69_spill] sm:$0xff] %v2299_v17 }
  0x91   : > { %532 = vmatpush2.msra.mxu0 %v2193_v14  ;;  %600 = vmatprep.subr.mxu1 %v2195_v61  ;;  %v2225_v14 = vld [vmem:[#allocation8 + $0x3e0] sm:$0xff]  ;;  %2881 = vst [vmem:[#allocation68_spill] sm:$0xff] %v2297_v19  ;;  %v2311_v9 = vld [vmem:[#allocation8 + $0x388] sm:$0xff] }
  0x92   : > { %533 = vmatprep.subr.mxu0 %v2199_v59  ;;  %601 = vmatpush1.msra.mxu1 %v2201_v63  ;;  %v2231_v59 = vld [vmem:[#allocation8 + $0x3d8] sm:$0xff]  ;;  %v479_v12 = vadd.f32 %v478_v35, %v477_v33  ;;  %2886 = vst [vmem:[#allocation73_spill] sm:$0xff] %v2311_v9  ;;  %v2317_v5 = vld [vmem:[#allocation8 + $0x380] sm:$0xff] }
  0x93   : > { %534 = vmatpush2.msra.mxu0 %v2205_v57  ;;  %602 = vmatprep.subr.mxu1 %v2207_v1  ;;  %v2235_v57 = vld [vmem:[#allocation8 + $0x1b8] sm:$0xff]  ;;  %2888 = vst [vmem:[#allocation75_spill] sm:$0xff] %v2317_v5  ;;  %v2321_v33 = vld [vmem:[#allocation8 + $0x160] sm:$0xff] }
  0x94   : > { %535 = vmatprep.subr.mxu0 %v2211_v55  ;;  %603 = vmatpush2.msra.mxu1 %v2213_v3  ;;  %2869 = vst [vmem:[#allocation56_spill] sm:$0xff] %v2235_v57  ;;  %v2241_v55 = vld [vmem:[#allocation8 + $0x1b0] sm:$0xff]  ;;  %2889 = vst [vmem:[#allocation76_spill] sm:$0xff] %v2321_v33  ;;  %v2323_v35 = vld [vmem:[#allocation8 + $0x378] sm:$0xff] }
  0x95   : > { %536 = vmatpush2.msra.mxu0 %v2217_v53  ;;  %604 = vmatprep.subr.mxu1 %v2219_v7  ;;  %2870 = vst [vmem:[#allocation57_spill] sm:$0xff] %v2241_v55  ;;  %v2249_v53 = vld [vmem:[#allocation8 + $0x3c0] sm:$0xff]  ;;  %2890 = vst [vmem:[#allocation77_spill] sm:$0xff] %v2323_v35 }
  0x96   : > { %537 = vmatprep.subr.mxu0 %v2223_v51  ;;  %605 = vmatpush2.msra.mxu1 %v2225_v14  ;;  %v2257_v51 = vld [vmem:[#allocation8 + $0x198] sm:$0xff] }
  0x97   : > { %538 = vmatpush2.msra.mxu0 %v2229_v49  ;;  %606 = vmatprep.subr.mxu1 %v2231_v59  ;;  %2873 = vst [vmem:[#allocation60_spill] sm:$0xff] %v2257_v51  ;;  %v2267_v49 = vld [vmem:[#allocation8 + $0x3b0] sm:$0xff] }
  0x98   : > { %539 = vmatprep.subr.mxu0 %v2235_v57  ;;  %607 = vmatpush2.msra.mxu1 %v2237_v47  ;;  %v2275_v57 = vld [vmem:[%s1986_s12 + $0x10] sm:$0xff] }
  0x99   : > { %540 = vmatpush2.msra.mxu0 %v2241_v55  ;;  %608 = vmatprep.subr.mxu1 %v2243_v45  ;;  %2877 = vst [vmem:[#allocation64_spill] sm:$0xff] %v2275_v57  ;;  %v2283_v55 = vld [vmem:[#allocation8 + $0x3a8] sm:$0xff]  ;;  %v470_v25 = vadd.f32 %v2275_v57, %v2272_v31  ;;  %v484_v23 = vmax.f32 %v2272_v31, %v2275_v57  ;;  %v2303_v57 = vld [vmem:[#allocation8 + $0x178] sm:$0xff] }
  0x9a   : > { %541 = vmatprep.subr.mxu0 %v2245_v43  ;;  %609 = vmatpush2.msra.mxu1 %v2249_v53  ;;  %v492_v43 = vrot.slane %v491_v29, 4  ;;  %2883 = vst [vmem:[#allocation70_spill] sm:$0xff] %v2303_v57 }
  0x9b   : > { %542 = vmatpush2.msra.mxu0 %v2251_v41  ;;  %610 = vmatprep.subr.mxu1 %v2253_v39  ;;  %v471_v15 = vrot.slane %v470_v25, 4  ;;  %v485_v31 = vrot.slane %v484_v23, 4  ;;  %v2305_v41 = vld [vmem:[#allocation8 + $0x390] sm:$0xff] }
  0x9c   : > { %543 = vmatprep.subr.mxu0 %v2257_v51  ;;  %611 = vmatpush2.msra.mxu1 %v2267_v49  ;;  %2884 = vst [vmem:[#allocation71_spill] sm:$0xff] %v2305_v41  ;;  %v2309_v51 = vld [vmem:[#allocation8 + $0x170] sm:$0xff]  ;;  %v493_v6 = vmax.f32 %v491_v29, %v492_v43 }
  0x9d   : > { %544 = vmatpush2.msra.mxu0 %v2281_v27  ;;  %612 = vmatprep.subr.mxu1 %v2283_v55  ;;  %2885 = vst [vmem:[#allocation72_spill] sm:$0xff] %v2309_v51  ;;  %v472_v8 = vadd.f32 %v471_v15, %v470_v25  ;;  %v2315_v27 = vld [vmem:[#allocation8 + $0x168] sm:$0xff]  ;;  %v2327_v15 = vld [vmem:[#allocation8 + $0x158] sm:$0xff]  ;;  %v2329_v25 = vld [vmem:[#allocation8 + $0x370] sm:$0xff] }
  0x9e   : > { %545 = vmatprep.subr.mxu0 %v2291_v21  ;;  %613 = vmatpush2.msra.mxu1 %v2293_v37  ;;  %2887 = vst [vmem:[#allocation74_spill] sm:$0xff] %v2315_v27  ;;  %v480_v21 = vrot.slane %v479_v12, 2  ;;  %v486_v37 = vmax.f32 %v484_v23, %v485_v31  ;;  %2891 = vst [vmem:[#allocation78_spill] sm:$0xff] %v2327_v15  ;;  %v2333_v43 = vld [vmem:[#allocation8 + $0x150] sm:$0xff]  ;;  %v2339_v23 = vld [vmem:[#allocation8 + $0x148] sm:$0xff] }
  0x9f   : > { %546 = vmatpush2.msra.mxu0 %v2297_v19  ;;  %614 = vmatprep.subr.mxu1 %v2299_v17  ;;  %2892 = vst [vmem:[#allocation79_spill] sm:$0xff] %v2329_v25  ;;  %v473_v29 = vrot.slane %v472_v8, 2  ;;  %2893 = vst [vmem:[#allocation80_spill] sm:$0xff] %v2333_v43  ;;  %v494_v19 = vrot.slane %v493_v6, 2  ;;  %v2341_v31 = vld [vmem:[#allocation8 + $0x360] sm:$0xff] }
  0xa0   : > { %547 = vmatprep.subr.mxu0 %v2303_v57  ;;  %615 = vmatpush2.msra.mxu1 %v2305_v41  ;;  %v2335_v57 = vld [vmem:[#allocation8 + $0x368] sm:$0xff]  ;;  %2895 = vst [vmem:[#allocation82_spill] sm:$0xff] %v2339_v23  ;;  %2896 = vst [vmem:[#allocation83_spill] sm:$0xff] %v2341_v31 }
  0xa1   : > { %548 = vmatpush2.msra.mxu0 %v2309_v51  ;;  %616 = vmatprep.subr.mxu1 %v2311_v9  ;;  %2894 = vst [vmem:[#allocation81_spill] sm:$0xff] %v2335_v57  ;;  %v2347_v51 = vld [vmem:[#allocation8 + $0x358] sm:$0xff]  ;;  %v487_v9 = vrot.slane %v486_v37, 2  ;;  %v474_v41 = vadd.f32 %v473_v29, %v472_v8  ;;  %v495_v17 = vmax.f32 %v493_v6, %v494_v19  ;;  %v2369_v8 = vld [vmem:[#allocation8 + $0x120] sm:$0xff]  ;;  %v2377_v19 = vld [vmem:[#allocation8 + $0x330] sm:$0xff] }
  0xa2   : > { %549 = vmatprep.subr.mxu0 %v2315_v27  ;;  %617 = vmatpush2.msra.mxu1 %v2317_v5  ;;  %v2345_v27 = vld [vmem:[#allocation8 + $0x140] sm:$0xff]  ;;  %2898 = vst [vmem:[#allocation85_spill] sm:$0xff] %v2347_v51  ;;  %v481_v5 = vadd.f32 %v480_v21, %v479_v12  ;;  %v2363_v12 = vld [vmem:[#allocation8 + $0x128] sm:$0xff]  ;;  %2905 = vst [vmem:[#allocation92_spill] sm:$0xff] %v2369_v8 }
  0xa3   : > { %550 = vmatpush2.msra.mxu0 %v2321_v33  ;;  %618 = vmatprep.subr.mxu1 %v2323_v35  ;;  %2897 = vst [vmem:[#allocation84_spill] sm:$0xff] %v2345_v27  ;;  %v2351_v33 = vld [vmem:[#allocation8 + $0x138] sm:$0xff]  ;;  %v2353_v35 = vld [vmem:[#allocation8 + $0x350] sm:$0xff]  ;;  %2903 = vst [vmem:[#allocation90_spill] sm:$0xff] %v2363_v12 }
  0xa4   : > { %551 = vmatprep.subr.mxu0 %v2327_v15  ;;  %619 = vmatpush2.msra.mxu1 %v2329_v25  ;;  %2899 = vst [vmem:[#allocation86_spill] sm:$0xff] %v2351_v33  ;;  %2900 = vst [vmem:[#allocation87_spill] sm:$0xff] %v2353_v35  ;;  %v2357_v15 = vld [vmem:[#allocation8 + $0x130] sm:$0xff]  ;;  %v2359_v25 = vld [vmem:[#allocation8 + $0x348] sm:$0xff] }
  0xa5   : > { %552 = vmatpush2.msra.mxu0 %v2333_v43  ;;  %620 = vmatprep.subr.mxu1 %v2335_v57  ;;  %2901 = vst [vmem:[#allocation88_spill] sm:$0xff] %v2357_v15  ;;  %2902 = vst [vmem:[#allocation89_spill] sm:$0xff] %v2359_v25  ;;  %v2365_v21 = vld [vmem:[#allocation8 + $0x340] sm:$0xff]  ;;  %v2371_v29 = vld [vmem:[#allocation8 + $0x338] sm:$0xff]  ;;  %v488_v43 = vmax.f32 %v486_v37, %v487_v9 }
  0xa6   : > { %553 = vmatprep.subr.mxu0 %v2339_v23  ;;  %621 = vmatpush2.msra.mxu1 %v2341_v31  ;;  %2904 = vst [vmem:[#allocation91_spill] sm:$0xff] %v2365_v21  ;;  %2906 = vst [vmem:[#allocation93_spill] sm:$0xff] %v2371_v29  ;;  %v482_v23 = vrot.slane %v481_v5, 1  ;;  %v2375_v6 = vld [vmem:[#allocation8 + $0x118] sm:$0xff]  ;;  %v2387_v9 = vld [vmem:[#allocation8 + $0x108] sm:$0xff] }
  0xa7   : > { %554 = vmatpush2.msra.mxu0 %v2345_v27  ;;  %622 = vmatprep.subr.mxu1 %v2347_v51  ;;  %2907 = vst [vmem:[#allocation94_spill] sm:$0xff] %v2375_v6  ;;  %v475_v27 = vrot.slane %v474_v41, 1  ;;  %v496_v51 = vrot.slane %v495_v17, 1  ;;  %2908 = vst [vmem:[#allocation95_spill] sm:$0xff] %v2387_v9  ;;  %v2389_v37 = vld [vmem:[#allocation8 + $0x320] sm:$0xff]  ;;  %v2402_v31 = vld [vmem:[%s1994_s2 + $0x30] sm:$0xff] }
  0xa8   : > { %555 = vmatprep.subr.mxu0 %v2351_v33  ;;  %623 = vmatpush2.msra.mxu1 %v2353_v35  ;;  %v2381_v33 = vld [vmem:[#allocation8 + $0x110] sm:$0xff]  ;;  %v2383_v35 = vld [vmem:[#allocation8 + $0x328] sm:$0xff]  ;;  %v2405_v57 = vld [vmem:[%s1994_s2 + $0x38] sm:$0xff] }
  0xa9   : > { %556 = vmatpush2.msra.mxu0 %v2357_v15  ;;  %624 = vmatprep.subr.mxu1 %v2359_v25  ;;  %v2395_v15 = vld [vmem:[#allocation8 + $0x318] sm:$0xff]  ;;  %v489_v25 = vrot.slane %v488_v43, 1  ;;  %2910 = vst [vmem:[#allocation97_spill] sm:$0xff] %v2405_v57 }
  0xaa   : > { %557 = vmatprep.subr.mxu0 %v2363_v12  ;;  %625 = vmatpush2.msra.mxu1 %v2365_v21  ;;  %v2393_v12 = vld [vmem:[#allocation8 + $0x100] sm:$0xff]  ;;  %v483_v21 = vadd.f32 %v482_v23, %v481_v5  ;;  %v2411_v5 = vld [vmem:[#allocation8 + $0x308] sm:$0xff]  ;;  %v1078_v23 = vmax.f32 %v2402_v31, %v2405_v57 }
  0xab   : > { %558 = vmatpush2.msra.mxu0 %v2369_v8  ;;  %626 = vmatprep.subr.mxu1 %v2371_v29  ;;  %2909 = vst [vmem:[#allocation96_spill] sm:$0xff] %v2393_v12  ;;  %v2399_v8 = vld [vmem:[#allocation8 + $0x310] sm:$0xff]  ;;  %v476_v29 = vadd.f32 %v475_v27, %v474_v41  ;;  %v2414_v27 = vld [vmem:[#allocation8 + $0x300] sm:$0xff]  ;;  %v490_v41 = vmax.f32 %v488_v43, %v489_v25 }
  0xac   : > { %559 = vmatprep.subr.mxu0 %v2375_v6  ;;  %627 = vmatpush2.msra.mxu1 %v2377_v19  ;;  %v497_v6 = vmax.f32 %v495_v17, %v496_v51  ;;  %v1070_v17 = vadd.f32 %v2405_v57, %v2402_v31  ;;  %v2422_v51 = vld [vmem:[%s1994_s2 + $0x20] sm:$0xff] }
  0xad   : > { %560 = vmatpush2.msra.mxu0 %v2381_v33  ;;  %628 = vmatprep.subr.mxu1 %v2383_v35 }
  0xae   : > { %561 = vmatprep.subr.mxu0 %v2387_v9  ;;  %629 = vmatpush2.msra.mxu1 %v2389_v37  ;;  %v1770_v9 = vmov 0.0  }
  0xaf   : > { %562 = vmatpush2.msra.mxu0 %v2393_v12  ;;  %630 = vmatprep.subr.mxu1 %v2395_v15  ;;  %v2425_v12 = vld [vmem:[%s1994_s2 + $0x28] sm:$0xff] }
  0xb0   : > { %563 = vmatprep.mubr.f32.mxu0 %v483_v21  ;;  %631 = vmatpush2.msra.mxu1 %v2399_v8  ;;  %v1075_v25 = vmax.f32 %v2422_v51, %v2425_v12  ;;  %v1067_v43 = vadd.f32 %v2425_v12, %v2422_v51 }
  0xb1   : > { %1470 = vmatprep.subr.mxu0 %v1770_v9  ;;  %564 = vmatmul.mubr.f32.vlgmr.msra.gmra.mxu0 %v476_v29 }
  0xb2   : > { %632 = vmatprep.subr.mxu1 %v2411_v5  ;;  %634 = vmatprep.mubr.f32.mxu1 %v497_v6 }
  0xb3   : > { %633 = vmatpush2.msra.mxu1 %v2414_v27  ;;  %1478 = vmatprep.mubr.msk.f32.mxu0 %vm1771_vm0, %v1770_v9 }
  0xb4   : > { %635 = vmatmul.mubr.f32.vlgmr.msra.gmra.mxu1 %v490_v41  ;;  %1079 = vmax.xlane.f32.xlu0 %v1078_v23 }
  0xb5   : > { %1071 = vadd.xlane.f32.xlu1 %v1070_v17  ;;  %v2440_v17 = vld [vmem:[%s2717_s3] sm:$0xf] }
  0xb8   : > { %1076 = vmax.xlane.f32.xlu0 %v1075_v25  ;;  %v2926_v25 = vld [vmem:[#allocation17_spill] sm:$0xff] }
  0xb9   : > { %1068 = vadd.xlane.f32.xlu1 %v1067_v43  ;;  %v2927_v43 = vld [vmem:[#allocation18_spill] sm:$0xff] }
  0xf9   : > { %v667_v21 = vpop.xlane.xlu0 %666 }
  0xfa   : > { %1471 = vmatpush3.msra.mxu0 %v667_v21  ;;  %v664_v29 = vpop.xlane.xlu1 %663  ;;  %v2928_v21 = vld [vmem:[#allocation19_spill] sm:$0xff] }
  0xfb   : > { %1472 = vmatprep.subr.mxu0 %v1770_v9 }
  0xfc   : > { %1473 = vmatpush3.msra.mxu0 %v664_v29  ;;  %v2929_v29 = vld [vmem:[#allocation20_spill] sm:$0xff] }
  0xfd   : > { %v658_v6 = vpop.xlane.xlu0 %657  ;;  %1474 = vmatprep.subr.mxu0 %v1770_v9 }
  0xfe   : > { %v661_v41 = vmul.f32 0.00390625, %v658_v6  ;;  %v655_v23 = vpop.xlane.xlu1 %654  ;;  %v2930_v6 = vld [vmem:[#allocation21_spill] sm:$0xff] }
  0xff   : > { %v660_v57 = vmul.f32 0.00390625, %v655_v23  ;;  %v2932_v23 = vld [vmem:[#allocation23_spill] sm:$0xff] }
 0x100   : > { %1475 = vmatpush3.msra.mxu0 %v661_v41  ;;  %v2931_v41 = vld [vmem:[#allocation22_spill] sm:$0xff] }
 0x101   : > { %1476 = vmatprep.subr.mxu0 %v1770_v9 }
 0x102   : > { %1477 = vmatpush3.msra.mxu0 %v660_v57 }
 0x103   : > { %1479 = vmatmul.mubr.msk.f32.vlgmr.msra.gmra.mxu0 %vm668_vm1, %v2440_v17  ;;  %984 = vmatprep.subr.mxu0 %v2017_v10  ;;  %v2911_v10 = vld [vmem:[#allocation67_spill] sm:$0xff] }
 0x104   : > { %985 = vmatpush1.msra.mxu0 %v2022_v13  ;;  %v2912_v13 = vld [vmem:[#allocation69_spill] sm:$0xff] }
 0x105   : > { %986 = vmatprep.subr.mxu0 %v2029_v16  ;;  %v2913_v16 = vld [vmem:[#allocation71_spill] sm:$0xff] }
 0x106   : > { %987 = vmatpush1.msra.mxu0 %v2035_v18  ;;  %v2914_v18 = vld [vmem:[#allocation73_spill] sm:$0xff] }
 0x107   : > { %988 = vmatprep.subr.mxu0 %v2040_v20  ;;  %v2915_v20 = vld [vmem:[#allocation75_spill] sm:$0xff] }
 0x108   : > { %989 = vmatpush1.msra.mxu0 %v2045_v22  ;;  %v2916_v22 = vld [vmem:[#allocation77_spill] sm:$0xff] }
 0x109   : > { %990 = vmatprep.subr.mxu0 %v2051_v24  ;;  %v2917_v24 = vld [vmem:[#allocation79_spill] sm:$0xff] }
 0x10a   : > { %991 = vmatpush1.msra.mxu0 %v2057_v26  ;;  %v2918_v26 = vld [vmem:[#allocation81_spill] sm:$0xff] }
 0x10b   : > { %992 = vmatprep.subr.mxu0 %v2063_v28  ;;  %v2919_v28 = vld [vmem:[#allocation83_spill] sm:$0xff] }
 0x10c   : > { %993 = vmatpush1.msra.mxu0 %v2069_v30  ;;  %v2920_v30 = vld [vmem:[#allocation85_spill] sm:$0xff] }
 0x10d   : > { %994 = vmatprep.subr.mxu0 %v2075_v32  ;;  %v2921_v32 = vld [vmem:[#allocation87_spill] sm:$0xff] }
 0x10e   : > { %995 = vmatpush1.msra.mxu0 %v2081_v34  ;;  %v2922_v34 = vld [vmem:[#allocation89_spill] sm:$0xff] }
 0x10f   : > { %996 = vmatprep.subr.mxu0 %v2087_v36  ;;  %v2923_v36 = vld [vmem:[#allocation91_spill] sm:$0xff] }
 0x110   : > { %997 = vmatpush1.msra.mxu0 %v2093_v38  ;;  %v2924_v38 = vld [vmem:[#allocation93_spill] sm:$0xff] }
 0x111   : > { %998 = vmatprep.subr.mxu0 %v2099_v40  ;;  %v2513_v40 = vstv %s461_s9 }
 0x112   : > { %999 = vmatpush1.msra.mxu0 %v2105_v42 }
 0x113   : > { %1000 = vmatprep.subr.mxu0 %v2111_v44 }
 0x114   : > { %1001 = vmatpush1.msra.mxu0 %v2117_v46 }
 0x115   : > { %1002 = vmatprep.subr.mxu0 %v2123_v48  ;;  %v2522_v48 = vld [vmem:[%s1986_s12 + $0x38] sm:$0xff] }
 0x116   : > { %1003 = vmatpush1.msra.mxu0 %v2129_v50  ;;  %v2528_v50 = vld [vmem:[%s1986_s12 + $0x30] sm:$0xff] }
 0x117   : > { %1004 = vmatprep.subr.mxu0 %v2135_v52 }
 0x118   : > { %1005 = vmatpush1.msra.mxu0 %v2141_v54 }
 0x119   : > { %1006 = vmatprep.subr.mxu0 %v2147_v56 }
 0x11a   : > { %1007 = vmatpush1.msra.mxu0 %v2153_v58 }
 0x11b   : > { %1008 = vmatprep.subr.mxu0 %v2159_v60 }
 0x11c   : > { %1009 = vmatpush1.msra.mxu0 %v2165_v62 }
 0x11d   : > { %1010 = vmatprep.subr.mxu0 %v2171_v0 }
 0x11e   : > { %1011 = vmatpush1.msra.mxu0 %v2177_v2 }
 0x11f   : > { %1012 = vmatprep.subr.mxu0 %v2183_v4 }
 0x120   : > { %1013 = vmatpush1.msra.mxu0 %v2189_v11 }
 0x121   : > { %1014 = vmatprep.subr.mxu0 %v2195_v61 }
 0x122   : > { %1015 = vmatpush1.msra.mxu0 %v2201_v63 }
 0x123   : > { %1016 = vmatprep.subr.mxu0 %v2207_v1 }
 0x124   : > { %1017 = vmatpush2.msra.mxu0 %v2213_v3 }
 0x125   : > { %1018 = vmatprep.subr.mxu0 %v2219_v7 }
 0x126   : > { %1019 = vmatpush2.msra.mxu0 %v2225_v14 }
 0x127   : > { %1020 = vmatprep.subr.mxu0 %v2231_v59 }
 0x128   : > { %1021 = vmatpush2.msra.mxu0 %v2237_v47  ;;  %v2519_v47 = vld [vmem:[%s1986_s12 + $0x28] sm:$0xff] }
 0x129   : > { %1022 = vmatprep.subr.mxu0 %v2243_v45  ;;  %v906_v52 = vmax.f32 %v2519_v47, %v2522_v48  ;;  %v892_v2 = vadd.f32 %v2522_v48, %v2519_v47 }
 0x12a   : > { %1023 = vmatpush2.msra.mxu0 %v2249_v53 }
 0x12b   : > { %1024 = vmatprep.subr.mxu0 %v2253_v39  ;;  %v459_v39 = vld [vmem:[%s2718_s4] sm:$0xff]  ;;  %v907_v54 = vrot.slane %v906_v52, 4  ;;  %v893_v3 = vrot.slane %v892_v2, 4 }
 0x12c   : > { %1025 = vmatpush2.msra.mxu0 %v2267_v49  ;;  %1483 = vmatprep.mubr.msk.f32.mxu1 %vm743_vm2, %v459_v39  ;;  %v2525_v49 = vld [vmem:[%s1986_s12 + $0x20] sm:$0xff]  ;;  %s1695_s12 = sshll.u32 %s1773_s18, 4  ;;  %s1696_s12 = int_to_ptr.vmem [resolvable:$false] %s1695_s12 }
 0x12d   : > { %1026 = vmatprep.subr.mxu0 %v2283_v55  ;;  %v899_v53 = vmax.f32 %v2525_v49, %v2528_v50  ;;  %v908_v56 = vmax.f32 %v906_v52, %v907_v54  ;;  %v894_v4 = vadd.f32 %v893_v3, %v892_v2  ;;  %v2951_v52 = vld [vmem:[#allocation42_spill] sm:$0xff]  ;;  %v2953_v54 = vld [vmem:[#allocation44_spill] sm:$0xff]  ;;  %v2964_v2 = vld [vmem:[#allocation55_spill] sm:$0xff]  ;;  %s1697_s30 = scalar_lea.vmem %s1696_s12, 2048  ;;  %p1698_p0 = scmp.lt.s32.totalorder %s2669_s22, %s1696_s12 }
 0x12e   : > { %1027 = vmatpush2.msra.mxu0 %v2911_v10  ;;  %v2933_v10 = vld [vmem:[#allocation24_spill] sm:$0xff]  ;;  %p1699_p5 = scmp.lt.s32.totalorder %s1697_s30, %s1691_s25 }
 0x12f   : > { %1028 = vmatprep.subr.mxu0 %v2912_v13  ;;  %v900_v55 = vrot.slane %v899_v53, 4  ;;  %v909_v58 = vrot.slane %v908_v56, 2  ;;  %v895_v7 = vrot.slane %v894_v4, 2  ;;  %v2934_v13 = vld [vmem:[#allocation25_spill] sm:$0xff]  ;;  %v2965_v3 = vld [vmem:[#allocation56_spill] sm:$0xff] }
 0x130   : > { %1029 = vmatpush2.msra.mxu0 %v2913_v16  ;;  %v2935_v16 = vld [vmem:[#allocation26_spill] sm:$0xff]  ;;  %p1700_p2 = por %p1699_p5, %p1698_p0 }
 0x131   : > { %1030 = vmatprep.subr.mxu0 %v2914_v18  ;;  %v901_v57 = vmax.f32 %v899_v53, %v900_v55  ;;  %v910_v60 = vmax.f32 %v908_v56, %v909_v58  ;;  %v896_v11 = vadd.f32 %v895_v7, %v894_v4  ;;  %v2936_v18 = vld [vmem:[#allocation27_spill] sm:$0xff]  ;;  %v2954_v55 = vld [vmem:[#allocation45_spill] sm:$0xff]  ;;  %v2955_v56 = vld [vmem:[#allocation46_spill] sm:$0xff] }
 0x132   : > { %1031 = vmatpush2.msra.mxu0 %v2915_v20  ;;  %v2937_v20 = vld [vmem:[#allocation28_spill] sm:$0xff]  ;;  %v2952_v53 = vld [vmem:[#allocation43_spill] sm:$0xff]  ;;  %v2966_v7 = vld [vmem:[#allocation57_spill] sm:$0xff]  ;;  %p1701_p10 = pnand %p1700_p2, %p1694_p13 }
 0x133   : > { %1032 = vmatprep.subr.mxu0 %v2916_v22  ;;  %v902_v59 = vrot.slane %v901_v57, 2  ;;  %v911_v62 = vrot.slane %v910_v60, 1  ;;  %v2938_v22 = vld [vmem:[#allocation29_spill] sm:$0xff]  ;;  %v2957_v58 = vld [vmem:[#allocation48_spill] sm:$0xff] }
 0x134   : > { %1033 = vmatpush2.msra.mxu0 %v2917_v24  ;;  %v2939_v24 = vld [vmem:[#allocation30_spill] sm:$0xff] }
 0x135   : > { %1034 = vmatprep.subr.mxu0 %v2918_v26  ;;  %v903_v61 = vmax.f32 %v901_v57, %v902_v59  ;;  %v912_v0 = vmax.f32 %v910_v60, %v911_v62  ;;  %v2940_v26 = vld [vmem:[#allocation31_spill] sm:$0xff]  ;;  %v2958_v59 = vld [vmem:[#allocation49_spill] sm:$0xff]  ;;  %v2959_v60 = vld [vmem:[#allocation50_spill] sm:$0xff] }
 0x136   : > { %1035 = vmatpush2.msra.mxu0 %v2919_v28  ;;  %v2941_v28 = vld [vmem:[#allocation32_spill] sm:$0xff]  ;;  %v2956_v57 = vld [vmem:[#allocation47_spill] sm:$0xff] }
 0x137   : > { %1036 = vmatprep.subr.mxu0 %v2920_v30  ;;  %v904_v63 = vrot.slane %v903_v61, 1  ;;  %1048 = vmatprep.mubr.f32.mxu0 %v912_v0  ;;  %v2942_v30 = vld [vmem:[#allocation33_spill] sm:$0xff]  ;;  %v2961_v62 = vld [vmem:[#allocation52_spill] sm:$0xff] }
 0x138   : > { %1037 = vmatpush2.msra.mxu0 %v2921_v32  ;;  %v2943_v32 = vld [vmem:[#allocation34_spill] sm:$0xff]  ;;  %v2962_v0 = vld [vmem:[#allocation53_spill] sm:$0xff] }
 0x139   : > { %1038 = vmatprep.subr.mxu0 %v2922_v34  ;;  %v905_v1 = vmax.f32 %v903_v61, %v904_v63  ;;  %v2944_v34 = vld [vmem:[#allocation35_spill] sm:$0xff]  ;;  %v885_v63 = vadd.f32 %v2528_v50, %v2525_v49 }
 0x13a   : > { %1039 = vmatpush2.msra.mxu0 %v2923_v36  ;;  %v2945_v36 = vld [vmem:[#allocation36_spill] sm:$0xff]  ;;  %v2960_v61 = vld [vmem:[#allocation51_spill] sm:$0xff] }
 0x13b   : > { %1040 = vmatprep.subr.mxu0 %v2924_v38  ;;  %v2946_v38 = vld [vmem:[#allocation37_spill] sm:$0xff]  ;;  %v886_v4 = vrot.slane %v885_v63, 4 }
 0x13c   : > { %1041 = vmatpush2.msra.mxu0 %v2377_v19 }
 0x13d   : > { %1042 = vmatprep.subr.mxu0 %v2383_v35  ;;  %v897_v35 = vrot.slane %v896_v11, 1 }
 0x13e   : > { %1043 = vmatpush2.msra.mxu0 %v2389_v37  ;;  %v2542_v37 = vld [vmem:[%s2718_s4 + $0x8] sm:$0xff] }
 0x13f   : > { %1044 = vmatprep.subr.mxu0 %v2395_v15 }
 0x140   : > { %1045 = vmatpush2.msra.mxu0 %v2399_v8 }
 0x141   : > { %1046 = vmatprep.subr.mxu0 %v2411_v5  ;;  %v898_v5 = vadd.f32 %v897_v35, %v896_v11  ;;  %v2967_v11 = vld [vmem:[#allocation58_spill] sm:$0xff]  ;;  %v2968_v35 = vld [vmem:[#allocation59_spill] sm:$0xff] }
 0x142   : > { %1047 = vmatpush2.msra.mxu0 %v2414_v27  ;;  %v2925_v27 = vld [vmem:[#allocation16_spill] sm:$0xff] }
 0x143   : > { %1049 = vmatmul.mubr.f32.vlgmr.msra.gmra.mxu0 %v905_v1  ;;  %v2963_v1 = vld [vmem:[#allocation54_spill] sm:$0xff] }
 0x144   : > { %1499 = vmatprep.mubr.msk.f32.mxu0 %vm743_vm2, %v459_v39  ;;  %v2947_v39 = vld [vmem:[#allocation38_spill] sm:$0xff] }
 0x171   : > { %v565_v42 = vpop.f32.mrf.mxu0 }
 0x172   : > { %v566_v44 = vadd.f32 %v565_v42, %v2513_v40  ;;  %v2948_v42 = vld [vmem:[#allocation39_spill] sm:$0xff] }
 0x173   : > { %v2537_v14 = vpop.f32.mrf.mxu0 }
 0x174   : > { %v636_v45 = vpop.f32.mrf.mxu1 }
 0x175   : > { %v2516_v46 = vadd.f32 %v636_v45, %v566_v44  ;;  %v2949_v44 = vld [vmem:[#allocation40_spill] sm:$0xff]  ;;  %v2950_v45 = vld [vmem:[#allocation41_spill] sm:$0xff] }
 0x1c3   : > { %v738_v15 = vpop.f32.mrf.mxu0 }
 0x1c4   : > { %v742_v8 = vmax.f32 %v738_v15, 0.0  ;;  %v2969_v15 = vld [vmem:[#allocation60_spill] sm:$0xff] }
 0x1c5   : > { %v1480_v19 = vpop.f32.mrf.mxu0 }
 0x1c6   : > { %1481 = vmatprep.subr.msk.mxu1 %vm750_vm3, %v742_v8  ;;  %v2970_v19 = vld [vmem:[#allocation65_spill] sm:$0xff] }
 0x1c7   : > { %1482 = vmatpush3.msk.msra.mxu1 %vm750_vm3, %v742_v8  ;;  %v887_v8 = vadd.f32 %v886_v4, %v885_v63  ;;  %v1414_v4 = vmul.f32 -1.442695, %v2516_v46 }
 0x1c8   : > { %1484 = vmatmul.mubr.msk.f32.vlgmr.msra.gmra.mxu1 %vm743_vm2, %v2542_v37  ;;  %913 = vmatprep.subr.mxu1 %v2925_v27  ;;  %v2972_v27 = vld [vmem:[#allocation68_spill] sm:$0xff] }
 0x1c9   : > { %914 = vmatpush1.msra.mxu1 %v2926_v25  ;;  %977 = vmatprep.mubr.f32.mxu1 %v898_v5  ;;  %v2971_v5 = vld [vmem:[#allocation66_spill] sm:$0xff] }
 0x1ca   : > { %915 = vmatprep.subr.mxu1 %v2927_v43  ;;  %v2973_v25 = vld [vmem:[#allocation70_spill] sm:$0xff]  ;;  %v888_v43 = vrot.slane %v887_v8, 2 }
 0x1cb   : > { %916 = vmatpush1.msra.mxu1 %v2928_v21  ;;  %v2974_v21 = vld [vmem:[#allocation72_spill] sm:$0xff] }
 0x1cc   : > { %917 = vmatprep.subr.mxu1 %v2929_v29  ;;  %v2975_v29 = vld [vmem:[#allocation74_spill] sm:$0xff] }
 0x1cd   : > { %918 = vmatpush1.msra.mxu1 %v2930_v6  ;;  %v2976_v6 = vld [vmem:[#allocation76_spill] sm:$0xff] }
 0x1ce   : > { %919 = vmatprep.subr.mxu1 %v2931_v41  ;;  %v2977_v41 = vld [vmem:[#allocation78_spill] sm:$0xff] }
 0x1cf   : > { %920 = vmatpush1.msra.mxu1 %v2932_v23  ;;  %v889_v23 = vadd.f32 %v888_v43, %v887_v8 }
 0x1d0   : > { %921 = vmatprep.subr.mxu1 %v2933_v10  ;;  %v2978_v10 = vld [vmem:[#allocation80_spill] sm:$0xff] }
 0x1d1   : > { %922 = vmatpush1.msra.mxu1 %v2934_v13  ;;  %v2979_v13 = vld [vmem:[#allocation82_spill] sm:$0xff] }
 0x1d2   : > { %923 = vmatprep.subr.mxu1 %v2935_v16  ;;  %v2980_v16 = vld [vmem:[#allocation84_spill] sm:$0xff] }
 0x1d3   : > { %924 = vmatpush1.msra.mxu1 %v2936_v18  ;;  %v2981_v18 = vld [vmem:[#allocation86_spill] sm:$0xff] }
 0x1d4   : > { %925 = vmatprep.subr.mxu1 %v2937_v20  ;;  %v890_v20 = vrot.slane %v889_v23, 1 }
 0x1d5   : > { %926 = vmatpush1.msra.mxu1 %v2938_v22  ;;  %v2982_v22 = vld [vmem:[#allocation88_spill] sm:$0xff] }
 0x1d6   : > { %927 = vmatprep.subr.mxu1 %v2939_v24  ;;  %v2983_v24 = vld [vmem:[#allocation90_spill] sm:$0xff] }
 0x1d7   : > { %928 = vmatpush1.msra.mxu1 %v2940_v26  ;;  %v1080_v26 = vpop.xlane.xlu0 %1079 }
 0x1d8   : > { %929 = vmatprep.subr.mxu1 %v2941_v28  ;;  %v1072_v28 = vpop.xlane.xlu1 %1071 }
 0x1d9   : > { %930 = vmatpush1.msra.mxu1 %v2942_v30  ;;  %v2984_v30 = vld [vmem:[#allocation92_spill] sm:$0xff] }
 0x1da   : > { %931 = vmatprep.subr.mxu1 %v2943_v32  ;;  %v2985_v32 = vld [vmem:[#allocation94_spill] sm:$0xff] }
 0x1db   : > { %932 = vmatpush1.msra.mxu1 %v2944_v34  ;;  %v891_v34 = vadd.f32 %v890_v20, %v889_v23  ;;  %v1605_v23 = vld [vmem:[%s1994_s2 + $0x10] sm:$0xff]  ;;  %v2990_v20 = vld [vmem:[#allocation63_spill] sm:$0xff] }
 0x1dc   : > { %933 = vmatprep.subr.mxu1 %v2945_v36  ;;  %v2986_v36 = vld [vmem:[#allocation95_spill] sm:$0xff] }
 0x1dd   : > { %934 = vmatpush1.msra.mxu1 %v2946_v38  ;;  %v2987_v38 = vld [vmem:[#allocation96_spill] sm:$0xff] }
 0x1de   : > { %935 = vmatprep.subr.mxu1 %v2947_v39  ;;  %v1077_v39 = vpop.xlane.xlu0 %1076 }
 0x1df   : > { %936 = vmatpush1.msra.mxu1 %v2948_v42  ;;  %v1069_v42 = vpop.xlane.xlu1 %1068 }
 0x1e0   : > { %937 = vmatprep.subr.mxu1 %v2949_v44  ;;  %v1074_v44 = vmul.f32 0.00390625, %v1072_v28 }
 0x1e1   : > { %938 = vmatpush1.msra.mxu1 %v2950_v45  ;;  %v1073_v45 = vmul.f32 0.00390625, %v1069_v42 }
 0x1e2   : > { %939 = vmatprep.subr.mxu1 %v2951_v52  ;;  %v638_v52 = vpop.f32.mrf.mxu1 }
 0x1e3   : > { %940 = vmatpush1.msra.mxu1 %v2952_v53 }
 0x1e4   : > { %941 = vmatprep.subr.mxu1 %v2953_v54 }
 0x1e5   : > { %942 = vmatpush1.msra.mxu1 %v2954_v55 }
 0x1e6   : > { %943 = vmatprep.subr.mxu1 %v2955_v56 }
 0x1e7   : > { %944 = vmatpush1.msra.mxu1 %v2956_v57 }
 0x1e8   : > { %945 = vmatprep.subr.mxu1 %v2957_v58 }
 0x1e9   : > { %946 = vmatpush2.msra.mxu1 %v2958_v59 }
 0x1ea   : > { %947 = vmatprep.subr.mxu1 %v2959_v60 }
 0x1eb   : > { %948 = vmatpush2.msra.mxu1 %v2960_v61 }
 0x1ec   : > { %949 = vmatprep.subr.mxu1 %v2961_v62 }
 0x1ed   : > { %950 = vmatpush2.msra.mxu1 %v2962_v0 }
 0x1ee   : > { %951 = vmatprep.subr.mxu1 %v2963_v1 }
 0x1ef   : > { %952 = vmatpush2.msra.mxu1 %v2964_v2  ;;  %v568_v2 = vadd.f32 %v2537_v14, %v2513_v40 }
 0x1f0   : > { %953 = vmatprep.subr.mxu1 %v2965_v3 }
 0x1f1   : > { %954 = vmatpush2.msra.mxu1 %v2966_v7  ;;  %v639_v3 = vadd.f32 %v638_v52, %v568_v2 }
 0x1f2   : > { %955 = vmatprep.subr.mxu1 %v2967_v11 }
 0x1f3   : > { %956 = vmatpush2.msra.mxu1 %v2968_v35  ;;  %v1415_v7 = vmul.f32 -1.442695, %v639_v3 }
 0x1f4   : > { %957 = vmatprep.subr.mxu1 %v2969_v15 }
 0x1f5   : > { %958 = vmatpush2.msra.mxu1 %v2970_v19  ;;  %v841_v19 = vlaneseq }
 0x1f6   : > { %959 = vmatprep.subr.mxu1 %v2971_v5 }
 0x1f7   : > { %960 = vmatpush2.msra.mxu1 %v2972_v27  ;;  %v842_v5 = vshrl.u32 %v841_v19, 7 }
 0x1f8   : > { %961 = vmatprep.subr.mxu1 %v2973_v25 }
 0x1f9   : > { %962 = vmatpush2.msra.mxu1 %v2974_v21  ;;  %v843_v27 = vsub.s32 0, %v842_v5  ;;  %v2988_v21 = vld [vmem:[#allocation64_spill] sm:$0xff] }
 0x1fa   : > { %963 = vmatprep.subr.mxu1 %v2975_v29 }
 0x1fb   : > { %964 = vmatpush2.msra.mxu1 %v2976_v6  ;;  %v2989_v6 = vld [vmem:[#allocation62_spill] sm:$0xff] }
 0x1fc   : > { %965 = vmatprep.subr.mxu1 %v2977_v41 }
 0x1fd   : > { %966 = vmatpush2.msra.mxu1 %v2978_v10 }
 0x1fe   : > { %967 = vmatprep.subr.mxu1 %v2979_v13  ;;  %v1606_v13 = vld [vmem:[%s1994_s2 + $0x18] sm:$0xff] }
 0x1ff   : > { %968 = vmatpush2.msra.mxu1 %v2980_v16 }
 0x200   : > { %969 = vmatprep.subr.mxu1 %v2981_v18 }
 0x201   : > { %970 = vmatpush2.msra.mxu1 %v2982_v22 }
 0x202   : > { %971 = vmatprep.subr.mxu1 %v2983_v24  ;;  %v2991_v24 = vld [vmem:[#allocation61_spill] sm:$0xff] }
 0x203   : > { %972 = vmatpush2.msra.mxu1 %v2984_v30 }
 0x204   : > { %973 = vmatprep.subr.mxu1 %v2985_v32  ;;  %v1607_v32 = vld [vmem:[%s1994_s2] sm:$0xff] }
 0x205   : > { %974 = vmatpush2.msra.mxu1 %v2381_v33  ;;  %v1772_v33 = vmov 0  }
 0x206   : > { %975 = vmatprep.subr.mxu1 %v2986_v36  ;;  %1572 = vset.pattern.permute.xlu1 %v1772_v33  ;;  %v1608_v36 = vld [vmem:[%s1994_s2 + $0x8] sm:$0xff] }
 0x207   : > { %976 = vmatpush2.msra.mxu1 %v2987_v38  ;;  %1571 = vset.pattern.permute.xlu0 %v1772_v33 }
 0x208   : > { %978 = vmatmul.mubr.f32.vlgmr.msra.gmra.mxu1 %v891_v34  ;;  %1486 = vmatprep.subr.mxu1 %v1770_v9 }
 0x209   : > { %1487 = vmatpush3.msra.mxu1 %v1080_v26  ;;  %1494 = vmatprep.mubr.msk.f32.mxu1 %vm1771_vm0, %v1770_v9 }
 0x20a   : > { %1488 = vmatprep.subr.mxu1 %v1770_v9 }
 0x20b   : > { %1489 = vmatpush3.msra.mxu1 %v1077_v39 }
 0x20c   : > { %1490 = vmatprep.subr.mxu1 %v1770_v9 }
 0x20d   : > { %1491 = vmatpush3.msra.mxu1 %v1074_v44  ;;  %v1050_v44 = vpop.f32.mrf.mxu0 }
 0x20e   : > { %1492 = vmatprep.subr.mxu1 %v1770_v9 }
 0x20f   : > { %1493 = vmatpush3.msra.mxu1 %v1073_v45  ;;  %v1052_v45 = vpop.f32.mrf.mxu0 }
 0x210   : > { %1495 = vmatmul.mubr.msk.f32.vlgmr.msra.gmra.mxu1 %vm668_vm1, %v2440_v17 }
 0x288   : > { %v1485_v53 = vpop.f32.mrf.mxu1 }
 0x289   : > { %v1421_v54 = vmul.f32 -1.442695, %v1485_v53 }
 0x28a   : > { %v820_v55 = vpop.f32.mrf.mxu1 }
 0x28b   : > { %1573 = vpow2.f32 %v1421_v54  ;;  %v1420_v56 = vmul.f32 -1.442695, %v820_v55 }
 0x28d   : > { %1575 = vpow2.f32 %v1420_v56 }
 0x298   : > { %v1574_v57 = vpop.eup %1573 }
 0x299   : > { %v836_v58 = vadd.f32 1.0, %v1574_v57 }
 0x29a   : > { %v1576_v59 = vpop.eup %1575 }
 0x29b   : > { %1577 = vrcp.f32 %v836_v58  ;;  %v835_v60 = vadd.f32 1.0, %v1576_v59 }
 0x29d   : > { %1579 = vrcp.f32 %v835_v60 }
 0x29e   : > { %1581 = vpow2.f32 %v1414_v4 }
 0x29f   : > { %1583 = vpow2.f32 %v1415_v7 }
 0x2a8   : > { %v1578_v9 = vpop.eup %1577 }
 0x2a9   : > { %860 = vperm.xlu1 %1572, %v1578_v9  }
 0x2aa   : > { %v1580_v61 = vpop.eup %1579 }
 0x2ab   : > { %855 = vperm.xlu0 %1571, %v1580_v61   ;;  %v1582_v11 = vpop.eup %1581 }
 0x2ac   : > { %v1584_v35 = vpop.eup %1583  ;;  %v647_v15 = vadd.f32 1.0, %v1582_v11 }
 0x2ad   : > { %v648_v8 = vadd.f32 1.0, %v1584_v35 }
 0x2ae   : > { %1585 = vrcp.f32 %v647_v15 }
 0x2af   : > { %1587 = vrcp.f32 %v648_v8 }
 0x2c8   : > { %v2622_v17 = vpop.f32.mrf.mxu1 }
 0x2c9   : > { %v980_v9 = vadd.f32 %v2622_v17, %v2513_v40 }
 0x2ca   : > { %v2624_v62 = vpop.f32.mrf.mxu1 }
 0x2cb   : > { %v982_v61 = vadd.f32 %v2624_v62, %v2513_v40 }
 0x2d0   : > { %v1147_v63 = vpop.f32.mrf.mxu1 }
 0x2d1   : > { %v1151_v0 = vmax.f32 %v1147_v63, 0.0  ;;  %v1051_v63 = vadd.f32 %v1050_v44, %v980_v9 }
 0x2d2   : > { %v1496_v1 = vpop.f32.mrf.mxu1 }
 0x2d3   : > { %1497 = vmatprep.subr.msk.mxu0 %vm750_vm3, %v1151_v0  ;;  %v1430_v1 = vmul.f32 -1.442695, %v1051_v63 }
 0x2d4   : > { %1498 = vmatpush3.msk.msra.mxu0 %vm750_vm3, %v1151_v0  ;;  %v1053_v0 = vadd.f32 %v1052_v45, %v982_v61 }
 0x2d5   : > { %1500 = vmatmul.mubr.msk.f32.vlgmr.msra.gmra.mxu0 %vm743_vm2, %v2542_v37  ;;  %v1586_v37 = vpop.eup %1585 }
 0x2d6   : > { %v1588_v14 = vpop.eup %1587  ;;  %v844_v25 = vrot.slane %v1586_v37, %v843_v27  ;;  %v1431_v2 = vmul.f32 -1.442695, %v1053_v0 }
 0x2d7   : > { %v848_v46 = vrot.slane %v1588_v14, %v843_v27 }
 0x2d8   : > { %v851_v29 = vmul.f32 %v844_v25, %v2988_v21  ;;  %v849_v22 = vmul.f32 %v844_v25, %v2990_v20 }
 0x2d9   : > { %v852_v41 = vmul.f32 %v848_v46, %v2989_v6  ;;  %v850_v26 = vmul.f32 %v848_v46, %v2991_v24 }
 0x324   : > { %v861_v43 = vpop.permute.xlu1 %860 }
 0x325   : > { %v865_v10 = vmul.f32 %v1605_v23, %v861_v43  ;;  %v866_v16 = vmul.f32 %v1606_v13, %v861_v43 }
 0x326   : > { %v856_v18 = vpop.permute.xlu0 %855 }
 0x327   : > { %v869_v28 = vadd.f32 %v865_v10, %v851_v29  ;;  %v870_v30 = vadd.f32 %v866_v16, %v852_v41  ;;  %v863_v34 = vmul.f32 %v1607_v32, %v856_v18  ;;  %v864_v38 = vmul.f32 %v1608_v36, %v856_v18 }
 0x329   : > { %873 = vst [vmem:[%s2642_s21 + $0x10] sm:$0xff] %v869_v28  ;;  %874 = vst [vmem:[%s2642_s21 + $0x18] sm:$0xff] %v870_v30  ;;  %v867_v39 = vadd.f32 %v863_v34, %v849_v22  ;;  %v868_v42 = vadd.f32 %v864_v38, %v850_v26 }
 0x32b   : > { %871 = vst [vmem:[%s2642_s21] sm:$0xff] %v867_v39  ;;  %872 = vst [vmem:[%s2642_s21 + $0x8] sm:$0xff] %v868_v42 }
 0x395   : > { %v1501_v33 = vpop.f32.mrf.mxu0 }
 0x396   : > { %v1437_v52 = vmul.f32 -1.442695, %v1501_v33 }
 0x397   : > { %v1221_v53 = vpop.f32.mrf.mxu0 }
 0x398   : > { %v1436_v54 = vmul.f32 -1.442695, %v1221_v53  ;;  %1589 = vpow2.f32 %v1437_v52 }
 0x39a   : > { %1591 = vpow2.f32 %v1436_v54 }
 0x3a5   : > { %v1590_v55 = vpop.eup %1589 }
 0x3a6   : > { %v1237_v58 = vadd.f32 1.0, %v1590_v55 }
 0x3a7   : > { %v1592_v56 = vpop.eup %1591 }
 0x3a8   : > { %v1236_v57 = vadd.f32 1.0, %v1592_v56 }
 0x3aa   : > { %1593 = vrcp.f32 %v1236_v57 }
 0x3ab   : > { %1595 = vrcp.f32 %v1237_v58 }
 0x3ac   : > { %1597 = vpow2.f32 %v1430_v1 }
 0x3ad   : > { %1599 = vpow2.f32 %v1431_v2 }
 0x3b7   : > { %v1594_v59 = vpop.eup %1593 }
 0x3b8   : > { %1256 = vperm.xlu1 %1572, %v1594_v59   ;;  %v1596_v60 = vpop.eup %1595 }
 0x3b9   : > { %v1598_v3 = vpop.eup %1597 }
 0x3ba   : > { %v1600_v4 = vpop.eup %1599  ;;  %v1061_v7 = vadd.f32 1.0, %v1598_v3 }
 0x3bb   : > { %v1062_v11 = vadd.f32 1.0, %v1600_v4 }
 0x3bc   : > { %1261 = vperm.xlu1 %1572, %v1596_v60   ;;  %1601 = vrcp.f32 %v1061_v7 }
 0x3bd   : > { %1603 = vrcp.f32 %v1062_v11 }
 0x3c9   : > { %v1602_v17 = vpop.eup %1601 }
 0x3ca   : > { %v1604_v35 = vpop.eup %1603  ;;  %v1245_v15 = vrot.slane %v1602_v17, %v843_v27 }
 0x3cb   : > { %v1249_v40 = vrot.slane %v1604_v35, %v843_v27 }
 0x3cc   : > { %v1250_v8 = vmul.f32 %v2525_v49, %v1245_v15  ;;  %v1252_v27 = vmul.f32 %v2528_v50, %v1245_v15 }
 0x3cd   : > { %v1251_v19 = vmul.f32 %v2519_v47, %v1249_v40  ;;  %v1253_v49 = vmul.f32 %v2522_v48, %v1249_v40 }
 0x433   : > { %v1257_v62 = vpop.permute.xlu1 %1256 }
 0x434   : > { %v1264_v5 = vmul.f32 %v2422_v51, %v1257_v62  ;;  %v1265_v37 = vmul.f32 %v2425_v12, %v1257_v62  ;;  %v2992_v51 = vld [vmem:[#allocation97_spill] sm:$0xff] }
 0x436   : > { %v1268_v14 = vadd.f32 %v1264_v5, %v1250_v8  ;;  %v1269_v25 = vadd.f32 %v1265_v37, %v1251_v19 }
 0x437   : > { %v1262_v46 = vpop.permute.xlu1 %1261 }
 0x438   : > { %1438 = vst [vmem:[%s2642_s21 + $0x20] sm:$0xff] %v1268_v14  ;;  %1439 = vst [vmem:[%s2642_s21 + $0x28] sm:$0xff] %v1269_v25  ;;  %v1266_v47 = vmul.f32 %v2402_v31, %v1262_v46  ;;  %v1267_v43 = vmul.f32 %v2992_v51, %v1262_v46 }
 0x43a   : > { %v1270_v12 = vadd.f32 %v1266_v47, %v1252_v27  ;;  %v1271_v21 = vadd.f32 %v1267_v43, %v1253_v49 }
 0x43c   : > { %1440 = vst [vmem:[%s2642_s21 + $0x30] sm:$0xff] %v1270_v12  ;;  %1441 = vst [vmem:[%s2642_s21 + $0x38] sm:$0xff] %v1271_v21 }
 0x43d   : > { %1704 = shalt.err (!%p1701_p10)
}
 0x43e   : > { %s1705_s17 = scalar_lea.hbm %s2667_s27, 1024  ;;  %s1709_s15 = scalar_lea.hbm %s2720_s6, 2048 }
 0x43f   : > { %p1706_p1 = scmp.ne.s32.totalorder %s2667_s27, %s1705_s17  ;;  %p1710_p7 = scmp.lt.s32.totalorder %s2667_s27, %s2720_s6 }
 0x440   : > { %p1711_p8 = scmp.lt.s32.totalorder %s1709_s15, %s1705_s17 }
 0x441   : > { %p1707_p4 = pnand %p1706_p1, %p2993_p9 }
 0x442   : > { %p1712_p11 = por %p1711_p8, %p1710_p7 }
 0x443   : > { %p1708_p3 = pneg %p1707_p4 }
 0x445   : > { %p1713_p6 = pnand %p1712_p11, %p1708_p3 }
 0x447   : > { %1716 = shalt.err (!%p1713_p6)
}
 0x448   : > { %s1774_s9 = smov 256   ;;  %s1775_s20 = smov 16  }
 0x449   : > { %1510 = dma.vmem_to_hbm [thread:$0]  (%p2993_p9), %s2669_s22, 1024, %s2667_s27, %s1278_s5, %s1774_s9, %s1774_s9, %s1775_s20  }
 0x44a PF: > { %s1307_s14 = sand.u32 1, %s1751_s23   ;;  %p2994_p12 = scmp.ne.s32.totalorder %s2815_s29, 0 }
 0x44b   : > { %p2995_p13 = scmp.ge.s32.totalorder %s1763_s26, 2  ;;  %s1308_s21 = scalar_lea.sflag [#allocation5], %s1307_s14 }
 0x44d   : > { %p1524_p0 = pnand %p2995_p13, %p2994_p12 }
 0x44f   : > { %p1525_p5 = pneg %p1524_p0 }
 0x451   : > { %1746 = dma.done.wait (%p1525_p5), %s1308_s21, 1024  }
 0x452   : > { %1748 = vsyncadd (%p1525_p5), %s1308_s21, 4294966272  ;;  %s2996_s13 = sld [smem:[#allocation14_spill]]  ;;  %p23_p2 = scmp.ge.s32.totalorder %s1868_s10, 4  }
 0x453   : > { %s2997_s25 = sld [smem:[#allocation15_spill]]  ;;  %s2998_s23 = smov %s1755_s24 }
 0x454   : > { %s3000_s26 = smov %s1868_s10  ;;  %25 = sbr.rel (!%p23_p2) target bundleno = 11 (0xb), region = 109 }
 0x458   : > { %s2999_s24 = smov %s2996_s13 }
 0x459   :  { %1313 = vsyncpa [#allocation4], 1 }
 0x45a   :  { %1315 = vsyncpa [#allocation4 + $0x1], 1 }
 0x45b   :  { %1316 = vsyncpa [#allocation7], 1 }
 0x45c   :  { %1318 = vsyncpa [#allocation7 + $0x1], 1 }
 0x45d   :  { %1319 = vsyncpa [#allocation5], 1 }
 0x45e   :  { %1321 = vsyncpa [#allocation5 + $0x1], 1 }

</bundles_post_ra>
